<compile_context>
chip_gen: v7x
topology: tpu7x:2x2x1
jax: 0.10.0
libtpu: 0.0.40
codegen_flags: <defaults>
</compile_context>

<pallas_src>
import functools
import math

import jax
import jax.numpy as jnp
from jax.experimental import pallas as pl
from jax.experimental.pallas import tpu as pltpu


_CONTRACT_LAST = (((1,), (1,)), ((), ()))   # A @ B.T for 2-D operands


def _layer_norm(v, g, b, eps):
    mu = jnp.mean(v, axis=-1, keepdims=True)
    var = jnp.mean((v - mu) ** 2, axis=-1, keepdims=True)
    return (v - mu) * jax.lax.rsqrt(var + eps) * g + b


# ----------------------------- Pallas kernels -------------------------------

def _block_kernel(x_ref, ln1_g_ref, ln1_b_ref,
                  w_qkv_ref, b_qkv_ref,
                  rel_emb_ref, w_pkq_ref, b_pkq_ref,
                  skew_ref,
                  w_o_ref, b_o_ref,
                  ln2_g_ref, ln2_b_ref,
                  w1_ref, b1_ref, w2_ref, b2_ref,
                  o_ref,
                  ctx_ref,
                  *, num_heads, d_k, scale, eps):
    """One full DisentangledTransformerBlock for a single batch element."""
    f32 = jnp.float32
    bf16 = jnp.bfloat16
    x = x_ref[...]                                   # (T, C) f32 residual stream
    T, C = x.shape

    # ---- LN1 + fused QKV projection (one (T,C)@(C,3C) bf16 MXU matmul) ----
    h = _layer_norm(x, ln1_g_ref[...], ln1_b_ref[...], eps)
    qkv = jnp.dot(h.astype(bf16), w_qkv_ref[...],
                  preferred_element_type=f32) + b_qkv_ref[...]        # (T, 3C) f32

    # ---- fused pos_key | pos_query projection of the rel-embedding table ----
    pos = jnp.dot(rel_emb_ref[...], w_pkq_ref[...],
                  preferred_element_type=f32) + b_pkq_ref[...]        # (2S, 2C) f32

    skew = skew_ref[...]                             # (2S, W) static 0/1 selector, f32
    row = jax.lax.broadcasted_iota(jnp.int32, (T, T), 0)
    col = jax.lax.broadcasted_iota(jnp.int32, (T, T), 1)
    causal = col <= row

    for hh in range(num_heads):                      # static unroll over heads
        lo = hh * d_k
        hi = lo + d_k
        # scale folded into q and pos_query (perf item 9)
        qh = (qkv[:, lo:hi] * scale).astype(bf16)              # (T, dk)
        kh = qkv[:, C + lo:C + hi].astype(bf16)                # (T, dk)
        vh = qkv[:, 2 * C + lo:2 * C + hi].astype(bf16)        # (T, dk)
        pkh = pos[:, lo:hi].astype(bf16)                       # (2S, dk) pos_key head
        pqh = (pos[:, C + lo:C + hi] * scale).astype(bf16)     # (2S, dk) pos_query head

        # content-to-content
        qk = jax.lax.dot_general(qh, kh, _CONTRACT_LAST,
                                 preferred_element_type=f32)   # (T, T)

        # Disentangled bias (reference semantics):
        #   c2p[i,j] = Q_i . pos_key[rel[i,j]] ; p2c[i,j] = K_i . pos_query[rel[i,j]]
        # rel[i,j] depends only on (j - i), so gather the summed table with a
        # static selector matmul (MXU) + a per-row strided roll (XLU skew):
        #   diag[i, m] = u[i, g(d)]  for m == d mod W   (other columns are zero)
        #   bias[i, j] = diag[i, (j - i) mod W]
        u = (jax.lax.dot_general(qh, pkh, _CONTRACT_LAST, preferred_element_type=f32) +
             jax.lax.dot_general(kh, pqh, _CONTRACT_LAST, preferred_element_type=f32))  # (T, 2S)
        diag = jnp.dot(u, skew, preferred_element_type=f32)    # (T, W)
        bias = pltpu.roll(diag, 0, axis=1, stride=1, stride_axis=0)[:, :T]   # (T, T)

        scores = jnp.where(causal, qk + bias, -1e30)           # f32 masked scores
        m = jnp.max(scores, axis=-1, keepdims=True)
        e = jnp.exp(scores - m)
        probs = e / jnp.sum(e, axis=-1, keepdims=True)
        # write this head's context straight into the VMEM scratch slice (item 6)
        ctx_ref[:, lo:hi] = jnp.dot(probs.astype(bf16), vh,
                                    preferred_element_type=f32)

    # ---- out projection + residual ----
    attn = jnp.dot(ctx_ref[...].astype(bf16), w_o_ref[...],
                   preferred_element_type=f32) + b_o_ref[...]
    x1 = x + attn

    # ---- LN2 + MLP + residual ----
    h2 = _layer_norm(x1, ln2_g_ref[...], ln2_b_ref[...], eps)
    m1 = jnp.maximum(jnp.dot(h2.astype(bf16), w1_ref[...],
                             preferred_element_type=f32) + b1_ref[...], 0.0)
    mlp = jnp.dot(m1.astype(bf16), w2_ref[...],
                  preferred_element_type=f32) + b2_ref[...]
    o_ref[...] = (x1 + mlp).astype(o_ref.dtype)


def _lnf_kernel(x_ref, g_ref, b_ref, o_ref, *, eps):
    """Fused final LayerNorm for one batch element (lm_head removed, item 1)."""
    o_ref[...] = _layer_norm(x_ref[...], g_ref[...], b_ref[...], eps).astype(o_ref.dtype)


# ----------------------------- wrappers --------------------------------------

def _rep2(shape):
    return pl.BlockSpec(shape, lambda b: (0, 0))


def block_forward(x, p, skew, *, num_heads, d_k, scale, eps=1e-5):
    B, T, C = x.shape
    S2 = p["rel_emb"].shape[0]
    W = skew.shape[1]
    hidden = p["w1"].shape[1]
    kern = functools.partial(_block_kernel, num_heads=num_heads, d_k=d_k,
                             scale=scale, eps=eps)
    return pl.pallas_call(
        kern,
        out_shape=jax.ShapeDtypeStruct((B, T, C), jnp.float32),
        grid=(B,),
        in_specs=[
            pl.BlockSpec((pl.Squeezed(), T, C), lambda b: (b, 0, 0)),   # x
            _rep2((1, C)), _rep2((1, C)),                               # ln1
            _rep2((C, 3 * C)), _rep2((1, 3 * C)),                       # fused qkv
            _rep2((S2, C)),                                             # rel_emb
            _rep2((C, 2 * C)), _rep2((1, 2 * C)),                       # fused pos proj
            _rep2((S2, W)),                                             # skew selector
            _rep2((C, C)), _rep2((1, C)),                               # out proj
            _rep2((1, C)), _rep2((1, C)),                               # ln2
            _rep2((C, hidden)), _rep2((1, hidden)),                     # mlp w1
            _rep2((hidden, C)), _rep2((1, C)),                          # mlp w2
        ],
        out_specs=pl.BlockSpec((pl.Squeezed(), T, C), lambda b: (b, 0, 0)),
        scratch_shapes=[pltpu.VMEM((T, C), jnp.float32)],               # ctx scratch
        input_output_aliases={0: 0},                                    # residual in place
        compiler_params=pltpu.CompilerParams(
            dimension_semantics=("parallel",),
            vmem_limit_bytes=64 * 1024 * 1024),
    )(x, p["ln1_g"], p["ln1_b"], p["w_qkv"], p["b_qkv"], p["rel_emb"],
      p["w_pkq"], p["b_pkq"], skew, p["wo"], p["bo"],
      p["ln2_g"], p["ln2_b"], p["w1"], p["b1"], p["w2"], p["b2"])


def final_forward(x, params, eps=1e-5):
    B, T, C = x.shape
    return pl.pallas_call(
        functools.partial(_lnf_kernel, eps=eps),
        out_shape=jax.ShapeDtypeStruct((B, T, C), jnp.float32),
        grid=(B,),
        in_specs=[
            pl.BlockSpec((pl.Squeezed(), T, C), lambda b: (b, 0, 0)),
            _rep2((1, C)), _rep2((1, C)),
        ],
        out_specs=pl.BlockSpec((pl.Squeezed(), T, C), lambda b: (b, 0, 0)),
        compiler_params=pltpu.CompilerParams(
            dimension_semantics=("parallel",),
            vmem_limit_bytes=64 * 1024 * 1024),
    )(x, params["lnf_g"], params["lnf_b"])


def build_skew_selector(T, span):
    """Static 0/1 matrix G (2S, W): (u @ G)[i, d mod W] == u[i, g(d)] for the
    relative offsets d = j - i in [-(T-1), T-1], with g the reference's double
    '+span' clamp.  Kernel then skews it into (T, T) with a strided roll."""
    S2 = 2 * span
    W = max(128, ((2 * T - 1 + 127) // 128) * 128)    # lane-dense width
    m = jnp.arange(W)
    d = jnp.where(m < T, m, m - W)                    # column m encodes offset d (mod W)
    valid = (m < T) | (m > W - T)
    g = jnp.clip(d + span, 0, S2 - 1)                 # build_relative_position clamp
    g = jnp.clip(g + span, 0, S2 - 1)                 # re-added in disentangled_attention_bias
    sel = jax.nn.one_hot(g, S2, dtype=jnp.float32) * valid[:, None].astype(jnp.float32)
    return sel.T                                      # (2S, W) f32


@functools.partial(jax.jit, static_argnums=(2, 3))
def decoder_forward(tokens, params, num_heads, span):
    B, T = tokens.shape
    C = params["emb"].shape[1]
    d_k = C // num_heads
    scale = 1.0 / math.sqrt(d_k * 3)                  # 1 + c2p + p2c
    skew = build_skew_selector(T, span)               # static, constant-folded
    x = params["emb"][tokens]                         # embedding lookup (XLA glue)
    for bp in params["blocks"]:
        x = block_forward(x, bp, skew, num_heads=num_heads, d_k=d_k, scale=scale)
    x_norm = final_forward(x, params)                 # lm_head dropped (logits unused)
    return x_norm, None


# ----------------------- pure-JAX reference (for checking) -------------------

@functools.partial(jax.jit, static_argnums=(2, 3))
def reference_forward(tokens, params, num_heads, span, eps=1e-5):
    f32, bf16 = jnp.float32, jnp.bfloat16
    x = params["emb"][tokens]
    B, T, C = x.shape
    d_k = C // num_heads
    scale = 1.0 / math.sqrt(d_k * 3)
    ctxp = jnp.arange(T)[:, None]
    memp = jnp.arange(T)[None, :]
    rel = memp - ctxp
    rel = jnp.clip(rel + span, 0, 2 * span - 1)
    rel = jnp.clip(rel + span, 0, 2 * span - 1)
    causal = memp <= ctxp

    for bp in params["blocks"]:
        h = _layer_norm(x, bp["ln1_g"], bp["ln1_b"], eps)
        qkv = jnp.dot(h.astype(bf16), bp["w_qkv"], preferred_element_type=f32) + bp["b_qkv"]
        pos = jnp.dot(bp["rel_emb"], bp["w_pkq"], preferred_element_type=f32) + bp["b_pkq"]
        heads = []
        for hh in range(num_heads):
            lo, hi = hh * d_k, (hh + 1) * d_k
            qs = (qkv[..., lo:hi] * scale).astype(bf16)
            kh = qkv[..., C + lo:C + hi].astype(bf16)
            vh = qkv[..., 2 * C + lo:2 * C + hi].astype(bf16)
            pk = pos[:, lo:hi].astype(bf16)
            pqs = (pos[:, C + lo:C + hi] * scale).astype(bf16)
            qk = jnp.einsum("btd,bsd->bts", qs, kh, preferred_element_type=f32)
            u = (jnp.einsum("btd,sd->bts", qs, pk, preferred_element_type=f32)
                 + jnp.einsum("btd,sd->bts", kh, pqs, preferred_element_type=f32))
            bias = jnp.take_along_axis(u, jnp.broadcast_to(rel[None], (B, T, T)), axis=2)
            scores = jnp.where(causal[None], qk + bias, -1e30)
            probs = jax.nn.softmax(scores, axis=-1)
            heads.append(jnp.einsum("bts,bsd->btd", probs.astype(bf16), vh,
                                    preferred_element_type=f32))
        ctx = jnp.concatenate(heads, axis=-1)
        x = x + jnp.dot(ctx.astype(bf16), bp["wo"], preferred_element_type=f32) + bp["bo"]
        h2 = _layer_norm(x, bp["ln2_g"], bp["ln2_b"], eps)
        m1 = jnp.maximum(jnp.dot(h2.astype(bf16), bp["w1"],
                                 preferred_element_type=f32) + bp["b1"], 0.0)
        x = x + jnp.dot(m1.astype(bf16), bp["w2"], preferred_element_type=f32) + bp["b2"]
    return _layer_norm(x, params["lnf_g"], params["lnf_b"], eps)


# ------------------------------ params ---------------------------------------

def init_params(key, vocab, d_model, num_heads, hidden, n_blocks, span):
    wdt = jnp.bfloat16                                 # matmul weights in bf16 (item 3)

    def lin(k, fi, fo):
        k1, k2 = jax.random.split(k)
        w = jax.random.normal(k1, (fi, fo), jnp.float32) * 0.1
        b = (jax.random.normal(k2, (fo,), jnp.float32) * 0.1).reshape(1, fo)
        return w, b

    keys = jax.random.split(key, 2 + n_blocks)
    params = {
        "emb": jax.random.normal(keys[0], (vocab, d_model), jnp.float32),
        "lnf_g": jnp.ones((1, d_model), jnp.float32),
        "lnf_b": jnp.zeros((1, d_model), jnp.float32),
    }
    # TODO(synk): lm_head params omitted — forward(targets=None) discards logits
    # (perf review item 1); add a V-tiled matmul kernel if a loss path is needed.

    blocks = []
    for bi in range(n_blocks):
        bk = jax.random.split(keys[2 + bi], 9)
        wq, bq = lin(bk[0], d_model, d_model)
        wk, bkk = lin(bk[1], d_model, d_model)
        wv, bv = lin(bk[2], d_model, d_model)
        wo, bo = lin(bk[3], d_model, d_model)
        wpk, bpk = lin(bk[4], d_model, d_model)        # pos_key_proj  (share_att_key=False)
        wpq, bpq = lin(bk[5], d_model, d_model)        # pos_query_proj
        w1, b1 = lin(bk[6], d_model, hidden)
        w2, b2 = lin(bk[7], hidden, d_model)
        rel = jax.random.normal(bk[8], (2 * span, d_model), jnp.float32)
        blocks.append({
            "w_qkv": jnp.concatenate([wq, wk, wv], axis=1).astype(wdt),
            "b_qkv": jnp.concatenate([bq, bkk, bv], axis=1),
            "w_pkq": jnp.concatenate([wpk, wpq], axis=1).astype(wdt),
            "b_pkq": jnp.concatenate([bpk, bpq], axis=1),
            "rel_emb": rel.astype(wdt),
            "wo": wo.astype(wdt), "bo": bo,
            "w1": w1.astype(wdt), "b1": b1,
            "w2": w2.astype(wdt), "b2": b2,
            "ln1_g": jnp.ones((1, d_model), jnp.float32),
            "ln1_b": jnp.zeros((1, d_model), jnp.float32),
            "ln2_g": jnp.ones((1, d_model), jnp.float32),
            "ln2_b": jnp.zeros((1, d_model), jnp.float32),
        })
    params["blocks"] = blocks
    return params


# ------------------------------ main ------------------------------------------

if __name__ == "__main__":
    VOCAB = 50
    D_MODEL = 32
    NUM_HEADS = 4
    HIDDEN = 64
    N_BLOCKS = 2
    MAX_POS = 16      # max_position_embeddings -> att_span = 16, rel-emb table = 32 rows
    B, T = 2, 8

    key = jax.random.PRNGKey(0)
    kp, kt = jax.random.split(key)
    params = init_params(kp, VOCAB, D_MODEL, NUM_HEADS, HIDDEN, N_BLOCKS, MAX_POS)
    tokens = jax.random.randint(kt, (B, T), 0, VOCAB, dtype=jnp.int32)

    x_out, loss = decoder_forward(tokens, params, NUM_HEADS, MAX_POS)
    jax.block_until_ready(x_out)
    assert x_out.shape == (B, T, D_MODEL) and loss is None
    assert bool(jnp.all(jnp.isfinite(x_out)))

    # Cross-check the fused kernels against a pure-JAX reference that uses the
    # straightforward gather formulation of the disentangled bias.
    x_ref = reference_forward(tokens, params, NUM_HEADS, MAX_POS)
    jax.block_until_ready(x_ref)
    max_err = float(jnp.max(jnp.abs(x_out - x_ref)))
    assert max_err < 2e-3, f"kernel/reference mismatch: {max_err}"

    print("KERNEL_OK")
</pallas_src>

<mosaic_0001>
module attributes {stable_mosaic.version = 11 : i64} {
  func.func @_lnf_kernel(%arg0: i32, %arg1: memref<1x8x32xf32, #tpu.memory_space<vmem>>, %arg2: memref<1x32xf32, #tpu.memory_space<vmem>>, %arg3: memref<1x32xf32, #tpu.memory_space<vmem>>, %arg4: memref<1x8x32xf32, #tpu.memory_space<vmem>>) attributes {dimension_semantics = [#tpu.dimension_semantics<parallel>], iteration_bounds = array<i64: 2>, scalar_prefetch = 0 : i64, scratch_operands = 0 : i64, tpu.core_type = #tpu.core_type<tc>, window_params = [{transform_indices = @transform_0, window_bounds = array<i64: 1, 8, 32>}, {pipeline_mode = #tpu.pipeline_mode<synchronous>, transform_indices = @transform_1, window_bounds = array<i64: 1, 32>}, {pipeline_mode = #tpu.pipeline_mode<synchronous>, transform_indices = @transform_2, window_bounds = array<i64: 1, 32>}, {transform_indices = @transform_3, window_bounds = array<i64: 1, 8, 32>}]} {
    %c0 = arith.constant 0 : index
    %c0_0 = arith.constant 0 : index
    %c0_1 = arith.constant 0 : index
    %0 = vector.load %arg1[%c0, %c0_0, %c0_1] : memref<1x8x32xf32, #tpu.memory_space<vmem>>, vector<1x8x32xf32>
    %1 = vector.shape_cast %0 : vector<1x8x32xf32> to vector<8x32xf32>
    %c0_2 = arith.constant 0 : index
    %c0_3 = arith.constant 0 : index
    %2 = vector.load %arg2[%c0_2, %c0_3] : memref<1x32xf32, #tpu.memory_space<vmem>>, vector<1x32xf32>
    %c0_4 = arith.constant 0 : index
    %c0_5 = arith.constant 0 : index
    %3 = vector.load %arg3[%c0_4, %c0_5] : memref<1x32xf32, #tpu.memory_space<vmem>>, vector<1x32xf32>
    %cst = arith.constant dense<0.000000e+00> : vector<8xf32>
    %4 = vector.multi_reduction <add>, %1, %cst [1] : vector<8x32xf32> to vector<8xf32>
    %5 = vector.shape_cast %4 : vector<8xf32> to vector<8x1xf32>
    %cst_6 = arith.constant 3.200000e+01 : f32
    %6 = vector.broadcast %cst_6 : f32 to vector<8x1xf32>
    %7 = arith.divf %5, %6 : vector<8x1xf32>
    %8 = vector.broadcast %7 : vector<8x1xf32> to vector<8x32xf32>
    %9 = arith.subf %1, %8 : vector<8x32xf32>
    %10 = arith.mulf %9, %9 : vector<8x32xf32>
    %cst_7 = arith.constant dense<0.000000e+00> : vector<8xf32>
    %11 = vector.multi_reduction <add>, %10, %cst_7 [1] : vector<8x32xf32> to vector<8xf32>
    %12 = vector.shape_cast %11 : vector<8xf32> to vector<8x1xf32>
    %cst_8 = arith.constant 3.200000e+01 : f32
    %13 = vector.broadcast %cst_8 : f32 to vector<8x1xf32>
    %14 = arith.divf %12, %13 : vector<8x1xf32>
    %15 = vector.broadcast %7 : vector<8x1xf32> to vector<8x32xf32>
    %16 = arith.subf %1, %15 : vector<8x32xf32>
    %cst_9 = arith.constant 9.99999974E-6 : f32
    %17 = vector.broadcast %cst_9 : f32 to vector<8x1xf32>
    %18 = arith.addf %14, %17 : vector<8x1xf32>
    %19 = math.rsqrt %18 : vector<8x1xf32>
    %20 = vector.broadcast %19 : vector<8x1xf32> to vector<8x32xf32>
    %21 = arith.mulf %16, %20 : vector<8x32xf32>
    %22 = vector.broadcast %2 : vector<1x32xf32> to vector<8x32xf32>
    %23 = arith.mulf %21, %22 : vector<8x32xf32>
    %24 = vector.broadcast %3 : vector<1x32xf32> to vector<8x32xf32>
    %25 = arith.addf %23, %24 : vector<8x32xf32>
    %c0_10 = arith.constant 0 : index
    %c0_11 = arith.constant 0 : index
    %c0_12 = arith.constant 0 : index
    %26 = vector.load %arg4[%c0_10, %c0_11, %c0_12] : memref<1x8x32xf32, #tpu.memory_space<vmem>>, vector<1x8x32xf32>
    %27 = vector.shape_cast %26 : vector<1x8x32xf32> to vector<8x32xf32>
    %28 = vector.shape_cast %25 : vector<8x32xf32> to vector<1x8x32xf32>
    tpu.vector_store %arg4[%c0_10, %c0_11, %c0_12], %28 {strides = array<i32>} : memref<1x8x32xf32, #tpu.memory_space<vmem>>, vector<1x8x32xf32>,
    return
  }
  func.func @transform_0(%arg0: i32) -> (i32, i32, i32) {
    %c0_i32 = arith.constant 0 : i32
    %c0_i32_0 = arith.constant 0 : i32
    %c0_i32_1 = arith.constant 0 : i32
    return %arg0, %c0_i32, %c0_i32_0 : i32, i32, i32
  }
  func.func @transform_1(%arg0: i32) -> (i32, i32) {
    %c0_i32 = arith.constant 0 : i32
    %c0_i32_0 = arith.constant 0 : i32
    %c0_i32_1 = arith.constant 0 : i32
    return %c0_i32, %c0_i32_0 : i32, i32
  }
  func.func @transform_2(%arg0: i32) -> (i32, i32) {
    %c0_i32 = arith.constant 0 : i32
    %c0_i32_0 = arith.constant 0 : i32
    %c0_i32_1 = arith.constant 0 : i32
    return %c0_i32, %c0_i32_0 : i32, i32
  }
  func.func @transform_3(%arg0: i32) -> (i32, i32, i32) {
    %c0_i32 = arith.constant 0 : i32
    %c0_i32_0 = arith.constant 0 : i32
    %c0_i32_1 = arith.constant 0 : i32
    return %arg0, %c0_i32, %c0_i32_0 : i32, i32, i32
  }
}

module attributes {stable_mosaic.version = 11 : i64} {
  func.func @_block_kernel(%arg0: i32, %arg1: memref<1x8x32xf32, #tpu.memory_space<vmem>>, %arg2: memref<1x32xf32, #tpu.memory_space<vmem>>, %arg3: memref<1x32xf32, #tpu.memory_space<vmem>>, %arg4: memref<32x96xbf16, #tpu.memory_space<vmem>>, %arg5: memref<1x96xf32, #tpu.memory_space<vmem>>, %arg6: memref<32x32xbf16, #tpu.memory_space<vmem>>, %arg7: memref<32x64xbf16, #tpu.memory_space<vmem>>, %arg8: memref<1x64xf32, #tpu.memory_space<vmem>>, %arg9: memref<32x128xf32, #tpu.memory_space<vmem>>, %arg10: memref<32x32xbf16, #tpu.memory_space<vmem>>, %arg11: memref<1x32xf32, #tpu.memory_space<vmem>>, %arg12: memref<1x32xf32, #tpu.memory_space<vmem>>, %arg13: memref<1x32xf32, #tpu.memory_space<vmem>>, %arg14: memref<32x64xbf16, #tpu.memory_space<vmem>>, %arg15: memref<1x64xf32, #tpu.memory_space<vmem>>, %arg16: memref<64x32xbf16, #tpu.memory_space<vmem>>, %arg17: memref<1x32xf32, #tpu.memory_space<vmem>>, %arg18: memref<1x8x32xf32, #tpu.memory_space<vmem>>, %arg19: memref<8x32xf32, #tpu.memory_space<vmem>>) attributes {dimension_semantics = [#tpu.dimension_semantics<parallel>], iteration_bounds = array<i64: 2>, scalar_prefetch = 0 : i64, scratch_operands = 1 : i64, tpu.core_type = #tpu.core_type<tc>, window_params = [{transform_indices = @transform_0, window_bounds = array<i64: 1, 8, 32>}, {pipeline_mode = #tpu.pipeline_mode<synchronous>, transform_indices = @transform_1, window_bounds = array<i64: 1, 32>}, {pipeline_mode = #tpu.pipeline_mode<synchronous>, transform_indices = @transform_2, window_bounds = array<i64: 1, 32>}, {pipeline_mode = #tpu.pipeline_mode<synchronous>, transform_indices = @transform_3, window_bounds = array<i64: 32, 96>}, {pipeline_mode = #tpu.pipeline_mode<synchronous>, transform_indices = @transform_4, window_bounds = array<i64: 1, 96>}, {pipeline_mode = #tpu.pipeline_mode<synchronous>, transform_indices = @transform_5, window_bounds = array<i64: 32, 32>}, {pipeline_mode = #tpu.pipeline_mode<synchronous>, transform_indices = @transform_6, window_bounds = array<i64: 32, 64>}, {pipeline_mode = #tpu.pipeline_mode<synchronous>, transform_indices = @transform_7, window_bounds = array<i64: 1, 64>}, {pipeline_mode = #tpu.pipeline_mode<synchronous>, transform_indices = @transform_8, window_bounds = array<i64: 32, 128>}, {pipeline_mode = #tpu.pipeline_mode<synchronous>, transform_indices = @transform_9, window_bounds = array<i64: 32, 32>}, {pipeline_mode = #tpu.pipeline_mode<synchronous>, transform_indices = @transform_10, window_bounds = array<i64: 1, 32>}, {pipeline_mode = #tpu.pipeline_mode<synchronous>, transform_indices = @transform_11, window_bounds = array<i64: 1, 32>}, {pipeline_mode = #tpu.pipeline_mode<synchronous>, transform_indices = @transform_12, window_bounds = array<i64: 1, 32>}, {pipeline_mode = #tpu.pipeline_mode<synchronous>, transform_indices = @transform_13, window_bounds = array<i64: 32, 64>}, {pipeline_mode = #tpu.pipeline_mode<synchronous>, transform_indices = @transform_14, window_bounds = array<i64: 1, 64>}, {pipeline_mode = #tpu.pipeline_mode<synchronous>, transform_indices = @transform_15, window_bounds = array<i64: 64, 32>}, {pipeline_mode = #tpu.pipeline_mode<synchronous>, transform_indices = @transform_16, window_bounds = array<i64: 1, 32>}, {transform_indices = @transform_17, window_bounds = array<i64: 1, 8, 32>}]} {
    %c0 = arith.constant 0 : index
    %c0_0 = arith.constant 0 : index
    %c0_1 = arith.constant 0 : index
    %0 = vector.load %arg1[%c0, %c0_0, %c0_1] : memref<1x8x32xf32, #tpu.memory_space<vmem>>, vector<1x8x32xf32>
    %1 = vector.shape_cast %0 : vector<1x8x32xf32> to vector<8x32xf32>
    %c0_2 = arith.constant 0 : index
    %c0_3 = arith.constant 0 : index
    %2 = vector.load %arg2[%c0_2, %c0_3] : memref<1x32xf32, #tpu.memory_space<vmem>>, vector<1x32xf32>
    %c0_4 = arith.constant 0 : index
    %c0_5 = arith.constant 0 : index
    %3 = vector.load %arg3[%c0_4, %c0_5] : memref<1x32xf32, #tpu.memory_space<vmem>>, vector<1x32xf32>
    %cst = arith.constant dense<0.000000e+00> : vector<8xf32>
    %4 = vector.multi_reduction <add>, %1, %cst [1] : vector<8x32xf32> to vector<8xf32>
    %5 = vector.shape_cast %4 : vector<8xf32> to vector<8x1xf32>
    %cst_6 = arith.constant 3.200000e+01 : f32
    %6 = vector.broadcast %cst_6 : f32 to vector<8x1xf32>
    %7 = arith.divf %5, %6 : vector<8x1xf32>
    %8 = vector.broadcast %7 : vector<8x1xf32> to vector<8x32xf32>
    %9 = arith.subf %1, %8 : vector<8x32xf32>
    %10 = arith.mulf %9, %9 : vector<8x32xf32>
    %cst_7 = arith.constant dense<0.000000e+00> : vector<8xf32>
    %11 = vector.multi_reduction <add>, %10, %cst_7 [1] : vector<8x32xf32> to vector<8xf32>
    %12 = vector.shape_cast %11 : vector<8xf32> to vector<8x1xf32>
    %cst_8 = arith.constant 3.200000e+01 : f32
    %13 = vector.broadcast %cst_8 : f32 to vector<8x1xf32>
    %14 = arith.divf %12, %13 : vector<8x1xf32>
    %15 = vector.broadcast %7 : vector<8x1xf32> to vector<8x32xf32>
    %16 = arith.subf %1, %15 : vector<8x32xf32>
    %cst_9 = arith.constant 9.99999974E-6 : f32
    %17 = vector.broadcast %cst_9 : f32 to vector<8x1xf32>
    %18 = arith.addf %14, %17 : vector<8x1xf32>
    %19 = math.rsqrt %18 : vector<8x1xf32>
    %20 = vector.broadcast %19 : vector<8x1xf32> to vector<8x32xf32>
    %21 = arith.mulf %16, %20 : vector<8x32xf32>
    %22 = vector.broadcast %2 : vector<1x32xf32> to vector<8x32xf32>
    %23 = arith.mulf %21, %22 : vector<8x32xf32>
    %24 = vector.broadcast %3 : vector<1x32xf32> to vector<8x32xf32>
    %25 = arith.addf %23, %24 : vector<8x32xf32>
    %26 = arith.truncf %25 : vector<8x32xf32> to vector<8x32xbf16>
    %c0_10 = arith.constant 0 : index
    %c0_11 = arith.constant 0 : index
    %27 = vector.load %arg4[%c0_10, %c0_11] : memref<32x96xbf16, #tpu.memory_space<vmem>>, vector<32x96xbf16>
    %cst_12 = arith.constant dense<0.000000e+00> : vector<8x96xf32>
    %28 = tpu.matmul %26, %27, %cst_12 {dimension_numbers = #tpu.dot_dimension_numbers<[1], [0], [0], [1], [0, 0, 1, 1], [], []>} : vector<8x32xbf16>, vector<32x96xbf16>, vector<8x96xf32> -> vector<8x96xf32>
    %c0_13 = arith.constant 0 : index
    %c0_14 = arith.constant 0 : index
    %29 = vector.load %arg5[%c0_13, %c0_14] : memref<1x96xf32, #tpu.memory_space<vmem>>, vector<1x96xf32>
    %30 = vector.broadcast %29 : vector<1x96xf32> to vector<8x96xf32>
    %31 = arith.addf %28, %30 : vector<8x96xf32>
    %c0_15 = arith.constant 0 : index
    %c0_16 = arith.constant 0 : index
    %32 = vector.load %arg6[%c0_15, %c0_16] : memref<32x32xbf16, #tpu.memory_space<vmem>>, vector<32x32xbf16>
    %c0_17 = arith.constant 0 : index
    %c0_18 = arith.constant 0 : index
    %33 = vector.load %arg7[%c0_17, %c0_18] : memref<32x64xbf16, #tpu.memory_space<vmem>>, vector<32x64xbf16>
    %cst_19 = arith.constant dense<0.000000e+00> : vector<32x64xf32>
    %34 = tpu.matmul %32, %33, %cst_19 {dimension_numbers = #tpu.dot_dimension_numbers<[1], [0], [0], [1], [0, 0, 1, 1], [], []>} : vector<32x32xbf16>, vector<32x64xbf16>, vector<32x64xf32> -> vector<32x64xf32>
    %c0_20 = arith.constant 0 : index
    %c0_21 = arith.constant 0 : index
    %35 = vector.load %arg8[%c0_20, %c0_21] : memref<1x64xf32, #tpu.memory_space<vmem>>, vector<1x64xf32>
    %36 = vector.broadcast %35 : vector<1x64xf32> to vector<32x64xf32>
    %37 = arith.addf %34, %36 : vector<32x64xf32>
    %c0_22 = arith.constant 0 : index
    %c0_23 = arith.constant 0 : index
    %38 = vector.load %arg9[%c0_22, %c0_23] : memref<32x128xf32, #tpu.memory_space<vmem>>, vector<32x128xf32>
    %39 = tpu.iota {dimensions = array<i32: 0>} : vector<8x8xi32>
    %40 = tpu.iota {dimensions = array<i32: 1>} : vector<8x8xi32>
    %41 = arith.cmpi sle, %40, %39 : vector<8x8xi32>
    %42 = vector.extract_strided_slice %31 {offsets = [0, 0], sizes = [8, 8], strides = [1, 1]} : vector<8x96xf32> to vector<8x8xf32>
    %cst_24 = arith.constant 0.204124153 : f32
    %43 = vector.broadcast %cst_24 : f32 to vector<8x8xf32>
    %44 = arith.mulf %42, %43 : vector<8x8xf32>
    %45 = arith.truncf %44 : vector<8x8xf32> to vector<8x8xbf16>
    %46 = vector.extract_strided_slice %31 {offsets = [0, 32], sizes = [8, 8], strides = [1, 1]} : vector<8x96xf32> to vector<8x8xf32>
    %47 = arith.truncf %46 : vector<8x8xf32> to vector<8x8xbf16>
    %48 = vector.extract_strided_slice %31 {offsets = [0, 64], sizes = [8, 8], strides = [1, 1]} : vector<8x96xf32> to vector<8x8xf32>
    %49 = arith.truncf %48 : vector<8x8xf32> to vector<8x8xbf16>
    %50 = vector.extract_strided_slice %37 {offsets = [0, 0], sizes = [32, 8], strides = [1, 1]} : vector<32x64xf32> to vector<32x8xf32>
    %51 = arith.truncf %50 : vector<32x8xf32> to vector<32x8xbf16>
    %52 = vector.extract_strided_slice %37 {offsets = [0, 32], sizes = [32, 8], strides = [1, 1]} : vector<32x64xf32> to vector<32x8xf32>
    %cst_25 = arith.constant 0.204124153 : f32
    %53 = vector.broadcast %cst_25 : f32 to vector<32x8xf32>
    %54 = arith.mulf %52, %53 : vector<32x8xf32>
    %55 = arith.truncf %54 : vector<32x8xf32> to vector<32x8xbf16>
    %cst_26 = arith.constant dense<0.000000e+00> : vector<8x8xf32>
    %56 = tpu.matmul %45, %47, %cst_26 {dimension_numbers = #tpu.dot_dimension_numbers<[1], [1], [0], [0], [0, 0, 1, 0], [], []>} : vector<8x8xbf16>, vector<8x8xbf16>, vector<8x8xf32> -> vector<8x8xf32>
    %cst_27 = arith.constant dense<0.000000e+00> : vector<8x32xf32>
    %57 = tpu.matmul %45, %51, %cst_27 {dimension_numbers = #tpu.dot_dimension_numbers<[1], [1], [0], [0], [0, 0, 1, 0], [], []>} : vector<8x8xbf16>, vector<32x8xbf16>, vector<8x32xf32> -> vector<8x32xf32>
    %cst_28 = arith.constant dense<0.000000e+00> : vector<8x32xf32>
    %58 = tpu.matmul %47, %55, %cst_28 {dimension_numbers = #tpu.dot_dimension_numbers<[1], [1], [0], [0], [0, 0, 1, 0], [], []>} : vector<8x8xbf16>, vector<32x8xbf16>, vector<8x32xf32> -> vector<8x32xf32>
    %59 = arith.addf %57, %58 : vector<8x32xf32>
    %cst_29 = arith.constant dense<0.000000e+00> : vector<8x128xf32>
    %60 = tpu.matmul %59, %38, %cst_29 {dimension_numbers = #tpu.dot_dimension_numbers<[1], [0], [0], [1], [0, 0, 1, 1], [], []>} : vector<8x32xf32>, vector<32x128xf32>, vector<8x128xf32> -> vector<8x128xf32>
    %c0_i32 = arith.constant 0 : i32
    %61 = tpu.dynamic_rotate %60 by %c0_i32 dim 1 {stride = 1 : si32, stride_dimension = 0 : si32} : vector<8x128xf32>, i32 -> vector<8x128xf32>
    %62 = vector.extract_strided_slice %61 {offsets = [0, 0], sizes = [8, 8], strides = [1, 1]} : vector<8x128xf32> to vector<8x8xf32>
    %63 = arith.addf %56, %62 : vector<8x8xf32>
    %cst_30 = arith.constant -1.000000e+30 : f32
    %64 = vector.broadcast %cst_30 : f32 to vector<8x8xf32>
    %65 = arith.select %41, %63, %64 : vector<8x8xi1>, vector<8x8xf32>
    %cst_31 = arith.constant dense<0xFF800000> : vector<8xf32>
    %66 = vector.multi_reduction <maximumf>, %65, %cst_31 [1] : vector<8x8xf32> to vector<8xf32>
    %67 = vector.shape_cast %66 : vector<8xf32> to vector<8x1xf32>
    %68 = vector.broadcast %67 : vector<8x1xf32> to vector<8x8xf32>
    %69 = arith.subf %65, %68 : vector<8x8xf32>
    %70 = math.exp %69 : vector<8x8xf32>
    %cst_32 = arith.constant dense<0.000000e+00> : vector<8xf32>
    %71 = vector.multi_reduction <add>, %70, %cst_32 [1] : vector<8x8xf32> to vector<8xf32>
    %72 = vector.shape_cast %71 : vector<8xf32> to vector<8x1xf32>
    %73 = vector.broadcast %72 : vector<8x1xf32> to vector<8x8xf32>
    %74 = arith.divf %70, %73 : vector<8x8xf32>
    %75 = arith.truncf %74 : vector<8x8xf32> to vector<8x8xbf16>
    %cst_33 = arith.constant dense<0.000000e+00> : vector<8x8xf32>
    %76 = tpu.matmul %75, %49, %cst_33 {dimension_numbers = #tpu.dot_dimension_numbers<[1], [0], [0], [1], [0, 0, 1, 1], [], []>} : vector<8x8xbf16>, vector<8x8xbf16>, vector<8x8xf32> -> vector<8x8xf32>
    %c0_34 = arith.constant 0 : index
    %c0_35 = arith.constant 0 : index
    %77 = vector.load %arg19[%c0_34, %c0_35] : memref<8x32xf32, #tpu.memory_space<vmem>>, vector<8x8xf32>
    tpu.vector_store %arg19[%c0_34, %c0_35], %76 {strides = array<i32>} : memref<8x32xf32, #tpu.memory_space<vmem>>, vector<8x8xf32>,
    %78 = vector.extract_strided_slice %31 {offsets = [0, 8], sizes = [8, 8], strides = [1, 1]} : vector<8x96xf32> to vector<8x8xf32>
    %cst_36 = arith.constant 0.204124153 : f32
    %79 = vector.broadcast %cst_36 : f32 to vector<8x8xf32>
    %80 = arith.mulf %78, %79 : vector<8x8xf32>
    %81 = arith.truncf %80 : vector<8x8xf32> to vector<8x8xbf16>
    %82 = vector.extract_strided_slice %31 {offsets = [0, 40], sizes = [8, 8], strides = [1, 1]} : vector<8x96xf32> to vector<8x8xf32>
    %83 = arith.truncf %82 : vector<8x8xf32> to vector<8x8xbf16>
    %84 = vector.extract_strided_slice %31 {offsets = [0, 72], sizes = [8, 8], strides = [1, 1]} : vector<8x96xf32> to vector<8x8xf32>
    %85 = arith.truncf %84 : vector<8x8xf32> to vector<8x8xbf16>
    %86 = vector.extract_strided_slice %37 {offsets = [0, 8], sizes = [32, 8], strides = [1, 1]} : vector<32x64xf32> to vector<32x8xf32>
    %87 = arith.truncf %86 : vector<32x8xf32> to vector<32x8xbf16>
    %88 = vector.extract_strided_slice %37 {offsets = [0, 40], sizes = [32, 8], strides = [1, 1]} : vector<32x64xf32> to vector<32x8xf32>
    %cst_37 = arith.constant 0.204124153 : f32
    %89 = vector.broadcast %cst_37 : f32 to vector<32x8xf32>
    %90 = arith.mulf %88, %89 : vector<32x8xf32>
    %91 = arith.truncf %90 : vector<32x8xf32> to vector<32x8xbf16>
    %cst_38 = arith.constant dense<0.000000e+00> : vector<8x8xf32>
    %92 = tpu.matmul %81, %83, %cst_38 {dimension_numbers = #tpu.dot_dimension_numbers<[1], [1], [0], [0], [0, 0, 1, 0], [], []>} : vector<8x8xbf16>, vector<8x8xbf16>, vector<8x8xf32> -> vector<8x8xf32>
    %cst_39 = arith.constant dense<0.000000e+00> : vector<8x32xf32>
    %93 = tpu.matmul %81, %87, %cst_39 {dimension_numbers = #tpu.dot_dimension_numbers<[1], [1], [0], [0], [0, 0, 1, 0], [], []>} : vector<8x8xbf16>, vector<32x8xbf16>, vector<8x32xf32> -> vector<8x32xf32>
    %cst_40 = arith.constant dense<0.000000e+00> : vector<8x32xf32>
    %94 = tpu.matmul %83, %91, %cst_40 {dimension_numbers = #tpu.dot_dimension_numbers<[1], [1], [0], [0], [0, 0, 1, 0], [], []>} : vector<8x8xbf16>, vector<32x8xbf16>, vector<8x32xf32> -> vector<8x32xf32>
    %95 = arith.addf %93, %94 : vector<8x32xf32>
    %cst_41 = arith.constant dense<0.000000e+00> : vector<8x128xf32>
    %96 = tpu.matmul %95, %38, %cst_41 {dimension_numbers = #tpu.dot_dimension_numbers<[1], [0], [0], [1], [0, 0, 1, 1], [], []>} : vector<8x32xf32>, vector<32x128xf32>, vector<8x128xf32> -> vector<8x128xf32>
    %c0_i32_42 = arith.constant 0 : i32
    %97 = tpu.dynamic_rotate %96 by %c0_i32_42 dim 1 {stride = 1 : si32, stride_dimension = 0 : si32} : vector<8x128xf32>, i32 -> vector<8x128xf32>
    %98 = vector.extract_strided_slice %97 {offsets = [0, 0], sizes = [8, 8], strides = [1, 1]} : vector<8x128xf32> to vector<8x8xf32>
    %99 = arith.addf %92, %98 : vector<8x8xf32>
    %cst_43 = arith.constant -1.000000e+30 : f32
    %100 = vector.broadcast %cst_43 : f32 to vector<8x8xf32>
    %101 = arith.select %41, %99, %100 : vector<8x8xi1>, vector<8x8xf32>
    %cst_44 = arith.constant dense<0xFF800000> : vector<8xf32>
    %102 = vector.multi_reduction <maximumf>, %101, %cst_44 [1] : vector<8x8xf32> to vector<8xf32>
    %103 = vector.shape_cast %102 : vector<8xf32> to vector<8x1xf32>
    %104 = vector.broadcast %103 : vector<8x1xf32> to vector<8x8xf32>
    %105 = arith.subf %101, %104 : vector<8x8xf32>
    %106 = math.exp %105 : vector<8x8xf32>
    %cst_45 = arith.constant dense<0.000000e+00> : vector<8xf32>
    %107 = vector.multi_reduction <add>, %106, %cst_45 [1] : vector<8x8xf32> to vector<8xf32>
    %108 = vector.shape_cast %107 : vector<8xf32> to vector<8x1xf32>
    %109 = vector.broadcast %108 : vector<8x1xf32> to vector<8x8xf32>
    %110 = arith.divf %106, %109 : vector<8x8xf32>
    %111 = arith.truncf %110 : vector<8x8xf32> to vector<8x8xbf16>
    %cst_46 = arith.constant dense<0.000000e+00> : vector<8x8xf32>
    %112 = tpu.matmul %111, %85, %cst_46 {dimension_numbers = #tpu.dot_dimension_numbers<[1], [0], [0], [1], [0, 0, 1, 1], [], []>} : vector<8x8xbf16>, vector<8x8xbf16>, vector<8x8xf32> -> vector<8x8xf32>
    %c0_47 = arith.constant 0 : index
    %c8 = arith.constant 8 : index
    %113 = vector.load %arg19[%c0_47, %c8] : memref<8x32xf32, #tpu.memory_space<vmem>>, vector<8x8xf32>
    tpu.vector_store %arg19[%c0_47, %c8], %112 {strides = array<i32>} : memref<8x32xf32, #tpu.memory_space<vmem>>, vector<8x8xf32>,
    %114 = vector.extract_strided_slice %31 {offsets = [0, 16], sizes = [8, 8], strides = [1, 1]} : vector<8x96xf32> to vector<8x8xf32>
    %cst_48 = arith.constant 0.204124153 : f32
    %115 = vector.broadcast %cst_48 : f32 to vector<8x8xf32>
    %116 = arith.mulf %114, %115 : vector<8x8xf32>
    %117 = arith.truncf %116 : vector<8x8xf32> to vector<8x8xbf16>
    %118 = vector.extract_strided_slice %31 {offsets = [0, 48], sizes = [8, 8], strides = [1, 1]} : vector<8x96xf32> to vector<8x8xf32>
    %119 = arith.truncf %118 : vector<8x8xf32> to vector<8x8xbf16>
    %120 = vector.extract_strided_slice %31 {offsets = [0, 80], sizes = [8, 8], strides = [1, 1]} : vector<8x96xf32> to vector<8x8xf32>
    %121 = arith.truncf %120 : vector<8x8xf32> to vector<8x8xbf16>
    %122 = vector.extract_strided_slice %37 {offsets = [0, 16], sizes = [32, 8], strides = [1, 1]} : vector<32x64xf32> to vector<32x8xf32>
    %123 = arith.truncf %122 : vector<32x8xf32> to vector<32x8xbf16>
    %124 = vector.extract_strided_slice %37 {offsets = [0, 48], sizes = [32, 8], strides = [1, 1]} : vector<32x64xf32> to vector<32x8xf32>
    %cst_49 = arith.constant 0.204124153 : f32
    %125 = vector.broadcast %cst_49 : f32 to vector<32x8xf32>
    %126 = arith.mulf %124, %125 : vector<32x8xf32>
    %127 = arith.truncf %126 : vector<32x8xf32> to vector<32x8xbf16>
    %cst_50 = arith.constant dense<0.000000e+00> : vector<8x8xf32>
    %128 = tpu.matmul %117, %119, %cst_50 {dimension_numbers = #tpu.dot_dimension_numbers<[1], [1], [0], [0], [0, 0, 1, 0], [], []>} : vector<8x8xbf16>, vector<8x8xbf16>, vector<8x8xf32> -> vector<8x8xf32>
    %cst_51 = arith.constant dense<0.000000e+00> : vector<8x32xf32>
    %129 = tpu.matmul %117, %123, %cst_51 {dimension_numbers = #tpu.dot_dimension_numbers<[1], [1], [0], [0], [0, 0, 1, 0], [], []>} : vector<8x8xbf16>, vector<32x8xbf16>, vector<8x32xf32> -> vector<8x32xf32>
    %cst_52 = arith.constant dense<0.000000e+00> : vector<8x32xf32>
    %130 = tpu.matmul %119, %127, %cst_52 {dimension_numbers = #tpu.dot_dimension_numbers<[1], [1], [0], [0], [0, 0, 1, 0], [], []>} : vector<8x8xbf16>, vector<32x8xbf16>, vector<8x32xf32> -> vector<8x32xf32>
    %131 = arith.addf %129, %130 : vector<8x32xf32>
    %cst_53 = arith.constant dense<0.000000e+00> : vector<8x128xf32>
    %132 = tpu.matmul %131, %38, %cst_53 {dimension_numbers = #tpu.dot_dimension_numbers<[1], [0], [0], [1], [0, 0, 1, 1], [], []>} : vector<8x32xf32>, vector<32x128xf32>, vector<8x128xf32> -> vector<8x128xf32>
    %c0_i32_54 = arith.constant 0 : i32
    %133 = tpu.dynamic_rotate %132 by %c0_i32_54 dim 1 {stride = 1 : si32, stride_dimension = 0 : si32} : vector<8x128xf32>, i32 -> vector<8x128xf32>
    %134 = vector.extract_strided_slice %133 {offsets = [0, 0], sizes = [8, 8], strides = [1, 1]} : vector<8x128xf32> to vector<8x8xf32>
    %135 = arith.addf %128, %134 : vector<8x8xf32>
    %cst_55 = arith.constant -1.000000e+30 : f32
    %136 = vector.broadcast %cst_55 : f32 to vector<8x8xf32>
    %137 = arith.select %41, %135, %136 : vector<8x8xi1>, vector<8x8xf32>
    %cst_56 = arith.constant dense<0xFF800000> : vector<8xf32>
    %138 = vector.multi_reduction <maximumf>, %137, %cst_56 [1] : vector<8x8xf32> to vector<8xf32>
    %139 = vector.shape_cast %138 : vector<8xf32> to vector<8x1xf32>
    %140 = vector.broadcast %139 : vector<8x1xf32> to vector<8x8xf32>
    %141 = arith.subf %137, %140 : vector<8x8xf32>
    %142 = math.exp %141 : vector<8x8xf32>
    %cst_57 = arith.constant dense<0.000000e+00> : vector<8xf32>
    %143 = vector.multi_reduction <add>, %142, %cst_57 [1] : vector<8x8xf32> to vector<8xf32>
    %144 = vector.shape_cast %143 : vector<8xf32> to vector<8x1xf32>
    %145 = vector.broadcast %144 : vector<8x1xf32> to vector<8x8xf32>
    %146 = arith.divf %142, %145 : vector<8x8xf32>
    %147 = arith.truncf %146 : vector<8x8xf32> to vector<8x8xbf16>
    %cst_58 = arith.constant dense<0.000000e+00> : vector<8x8xf32>
    %148 = tpu.matmul %147, %121, %cst_58 {dimension_numbers = #tpu.dot_dimension_numbers<[1], [0], [0], [1], [0, 0, 1, 1], [], []>} : vector<8x8xbf16>, vector<8x8xbf16>, vector<8x8xf32> -> vector<8x8xf32>
    %c0_59 = arith.constant 0 : index
    %c16 = arith.constant 16 : index
    %149 = vector.load %arg19[%c0_59, %c16] : memref<8x32xf32, #tpu.memory_space<vmem>>, vector<8x8xf32>
    tpu.vector_store %arg19[%c0_59, %c16], %148 {strides = array<i32>} : memref<8x32xf32, #tpu.memory_space<vmem>>, vector<8x8xf32>,
    %150 = vector.extract_strided_slice %31 {offsets = [0, 24], sizes = [8, 8], strides = [1, 1]} : vector<8x96xf32> to vector<8x8xf32>
    %cst_60 = arith.constant 0.204124153 : f32
    %151 = vector.broadcast %cst_60 : f32 to vector<8x8xf32>
    %152 = arith.mulf %150, %151 : vector<8x8xf32>
    %153 = arith.truncf %152 : vector<8x8xf32> to vector<8x8xbf16>
    %154 = vector.extract_strided_slice %31 {offsets = [0, 56], sizes = [8, 8], strides = [1, 1]} : vector<8x96xf32> to vector<8x8xf32>
    %155 = arith.truncf %154 : vector<8x8xf32> to vector<8x8xbf16>
    %156 = vector.extract_strided_slice %31 {offsets = [0, 88], sizes = [8, 8], strides = [1, 1]} : vector<8x96xf32> to vector<8x8xf32>
    %157 = arith.truncf %156 : vector<8x8xf32> to vector<8x8xbf16>
    %158 = vector.extract_strided_slice %37 {offsets = [0, 24], sizes = [32, 8], strides = [1, 1]} : vector<32x64xf32> to vector<32x8xf32>
    %159 = arith.truncf %158 : vector<32x8xf32> to vector<32x8xbf16>
    %160 = vector.extract_strided_slice %37 {offsets = [0, 56], sizes = [32, 8], strides = [1, 1]} : vector<32x64xf32> to vector<32x8xf32>
    %cst_61 = arith.constant 0.204124153 : f32
    %161 = vector.broadcast %cst_61 : f32 to vector<32x8xf32>
    %162 = arith.mulf %160, %161 : vector<32x8xf32>
    %163 = arith.truncf %162 : vector<32x8xf32> to vector<32x8xbf16>
    %cst_62 = arith.constant dense<0.000000e+00> : vector<8x8xf32>
    %164 = tpu.matmul %153, %155, %cst_62 {dimension_numbers = #tpu.dot_dimension_numbers<[1], [1], [0], [0], [0, 0, 1, 0], [], []>} : vector<8x8xbf16>, vector<8x8xbf16>, vector<8x8xf32> -> vector<8x8xf32>
    %cst_63 = arith.constant dense<0.000000e+00> : vector<8x32xf32>
    %165 = tpu.matmul %153, %159, %cst_63 {dimension_numbers = #tpu.dot_dimension_numbers<[1], [1], [0], [0], [0, 0, 1, 0], [], []>} : vector<8x8xbf16>, vector<32x8xbf16>, vector<8x32xf32> -> vector<8x32xf32>
    %cst_64 = arith.constant dense<0.000000e+00> : vector<8x32xf32>
    %166 = tpu.matmul %155, %163, %cst_64 {dimension_numbers = #tpu.dot_dimension_numbers<[1], [1], [0], [0], [0, 0, 1, 0], [], []>} : vector<8x8xbf16>, vector<32x8xbf16>, vector<8x32xf32> -> vector<8x32xf32>
    %167 = arith.addf %165, %166 : vector<8x32xf32>
    %cst_65 = arith.constant dense<0.000000e+00> : vector<8x128xf32>
    %168 = tpu.matmul %167, %38, %cst_65 {dimension_numbers = #tpu.dot_dimension_numbers<[1], [0], [0], [1], [0, 0, 1, 1], [], []>} : vector<8x32xf32>, vector<32x128xf32>, vector<8x128xf32> -> vector<8x128xf32>
    %c0_i32_66 = arith.constant 0 : i32
    %169 = tpu.dynamic_rotate %168 by %c0_i32_66 dim 1 {stride = 1 : si32, stride_dimension = 0 : si32} : vector<8x128xf32>, i32 -> vector<8x128xf32>
    %170 = vector.extract_strided_slice %169 {offsets = [0, 0], sizes = [8, 8], strides = [1, 1]} : vector<8x128xf32> to vector<8x8xf32>
    %171 = arith.addf %164, %170 : vector<8x8xf32>
    %cst_67 = arith.constant -1.000000e+30 : f32
    %172 = vector.broadcast %cst_67 : f32 to vector<8x8xf32>
    %173 = arith.select %41, %171, %172 : vector<8x8xi1>, vector<8x8xf32>
    %cst_68 = arith.constant dense<0xFF800000> : vector<8xf32>
    %174 = vector.multi_reduction <maximumf>, %173, %cst_68 [1] : vector<8x8xf32> to vector<8xf32>
    %175 = vector.shape_cast %174 : vector<8xf32> to vector<8x1xf32>
    %176 = vector.broadcast %175 : vector<8x1xf32> to vector<8x8xf32>
    %177 = arith.subf %173, %176 : vector<8x8xf32>
    %178 = math.exp %177 : vector<8x8xf32>
    %cst_69 = arith.constant dense<0.000000e+00> : vector<8xf32>
    %179 = vector.multi_reduction <add>, %178, %cst_69 [1] : vector<8x8xf32> to vector<8xf32>
    %180 = vector.shape_cast %179 : vector<8xf32> to vector<8x1xf32>
    %181 = vector.broadcast %180 : vector<8x1xf32> to vector<8x8xf32>
    %182 = arith.divf %178, %181 : vector<8x8xf32>
    %183 = arith.truncf %182 : vector<8x8xf32> to vector<8x8xbf16>
    %cst_70 = arith.constant dense<0.000000e+00> : vector<8x8xf32>
    %184 = tpu.matmul %183, %157, %cst_70 {dimension_numbers = #tpu.dot_dimension_numbers<[1], [0], [0], [1], [0, 0, 1, 1], [], []>} : vector<8x8xbf16>, vector<8x8xbf16>, vector<8x8xf32> -> vector<8x8xf32>
    %c0_71 = arith.constant 0 : index
    %c24 = arith.constant 24 : index
    %185 = vector.load %arg19[%c0_71, %c24] : memref<8x32xf32, #tpu.memory_space<vmem>>, vector<8x8xf32>
    tpu.vector_store %arg19[%c0_71, %c24], %184 {strides = array<i32>} : memref<8x32xf32, #tpu.memory_space<vmem>>, vector<8x8xf32>,
    %c0_72 = arith.constant 0 : index
    %c0_73 = arith.constant 0 : index
    %186 = vector.load %arg19[%c0_72, %c0_73] : memref<8x32xf32, #tpu.memory_space<vmem>>, vector<8x32xf32>
    %187 = arith.truncf %186 : vector<8x32xf32> to vector<8x32xbf16>
    %c0_74 = arith.constant 0 : index
    %c0_75 = arith.constant 0 : index
    %188 = vector.load %arg10[%c0_74, %c0_75] : memref<32x32xbf16, #tpu.memory_space<vmem>>, vector<32x32xbf16>
    %cst_76 = arith.constant dense<0.000000e+00> : vector<8x32xf32>
    %189 = tpu.matmul %187, %188, %cst_76 {dimension_numbers = #tpu.dot_dimension_numbers<[1], [0], [0], [1], [0, 0, 1, 1], [], []>} : vector<8x32xbf16>, vector<32x32xbf16>, vector<8x32xf32> -> vector<8x32xf32>
    %c0_77 = arith.constant 0 : index
    %c0_78 = arith.constant 0 : index
    %190 = vector.load %arg11[%c0_77, %c0_78] : memref<1x32xf32, #tpu.memory_space<vmem>>, vector<1x32xf32>
    %191 = vector.broadcast %190 : vector<1x32xf32> to vector<8x32xf32>
    %192 = arith.addf %189, %191 : vector<8x32xf32>
    %193 = arith.addf %1, %192 : vector<8x32xf32>
    %c0_79 = arith.constant 0 : index
    %c0_80 = arith.constant 0 : index
    %194 = vector.load %arg12[%c0_79, %c0_80] : memref<1x32xf32, #tpu.memory_space<vmem>>, vector<1x32xf32>
    %c0_81 = arith.constant 0 : index
    %c0_82 = arith.constant 0 : index
    %195 = vector.load %arg13[%c0_81, %c0_82] : memref<1x32xf32, #tpu.memory_space<vmem>>, vector<1x32xf32>
    %cst_83 = arith.constant dense<0.000000e+00> : vector<8xf32>
    %196 = vector.multi_reduction <add>, %193, %cst_83 [1] : vector<8x32xf32> to vector<8xf32>
    %197 = vector.shape_cast %196 : vector<8xf32> to vector<8x1xf32>
    %cst_84 = arith.constant 3.200000e+01 : f32
    %198 = vector.broadcast %cst_84 : f32 to vector<8x1xf32>
    %199 = arith.divf %197, %198 : vector<8x1xf32>
    %200 = vector.broadcast %199 : vector<8x1xf32> to vector<8x32xf32>
    %201 = arith.subf %193, %200 : vector<8x32xf32>
    %202 = arith.mulf %201, %201 : vector<8x32xf32>
    %cst_85 = arith.constant dense<0.000000e+00> : vector<8xf32>
    %203 = vector.multi_reduction <add>, %202, %cst_85 [1] : vector<8x32xf32> to vector<8xf32>
    %204 = vector.shape_cast %203 : vector<8xf32> to vector<8x1xf32>
    %cst_86 = arith.constant 3.200000e+01 : f32
    %205 = vector.broadcast %cst_86 : f32 to vector<8x1xf32>
    %206 = arith.divf %204, %205 : vector<8x1xf32>
    %207 = vector.broadcast %199 : vector<8x1xf32> to vector<8x32xf32>
    %208 = arith.subf %193, %207 : vector<8x32xf32>
    %cst_87 = arith.constant 9.99999974E-6 : f32
    %209 = vector.broadcast %cst_87 : f32 to vector<8x1xf32>
    %210 = arith.addf %206, %209 : vector<8x1xf32>
    %211 = math.rsqrt %210 : vector<8x1xf32>
    %212 = vector.broadcast %211 : vector<8x1xf32> to vector<8x32xf32>
    %213 = arith.mulf %208, %212 : vector<8x32xf32>
    %214 = vector.broadcast %194 : vector<1x32xf32> to vector<8x32xf32>
    %215 = arith.mulf %213, %214 : vector<8x32xf32>
    %216 = vector.broadcast %195 : vector<1x32xf32> to vector<8x32xf32>
    %217 = arith.addf %215, %216 : vector<8x32xf32>
    %218 = arith.truncf %217 : vector<8x32xf32> to vector<8x32xbf16>
    %c0_88 = arith.constant 0 : index
    %c0_89 = arith.constant 0 : index
    %219 = vector.load %arg14[%c0_88, %c0_89] : memref<32x64xbf16, #tpu.memory_space<vmem>>, vector<32x64xbf16>
    %cst_90 = arith.constant dense<0.000000e+00> : vector<8x64xf32>
    %220 = tpu.matmul %218, %219, %cst_90 {dimension_numbers = #tpu.dot_dimension_numbers<[1], [0], [0], [1], [0, 0, 1, 1], [], []>} : vector<8x32xbf16>, vector<32x64xbf16>, vector<8x64xf32> -> vector<8x64xf32>
    %c0_91 = arith.constant 0 : index
    %c0_92 = arith.constant 0 : index
    %221 = vector.load %arg15[%c0_91, %c0_92] : memref<1x64xf32, #tpu.memory_space<vmem>>, vector<1x64xf32>
    %222 = vector.broadcast %221 : vector<1x64xf32> to vector<8x64xf32>
    %223 = arith.addf %220, %222 : vector<8x64xf32>
    %cst_93 = arith.constant 0.000000e+00 : f32
    %224 = vector.broadcast %cst_93 : f32 to vector<8x64xf32>
    %225 = arith.maximumf %223, %224 : vector<8x64xf32>
    %226 = arith.truncf %225 : vector<8x64xf32> to vector<8x64xbf16>
    %c0_94 = arith.constant 0 : index
    %c0_95 = arith.constant 0 : index
    %227 = vector.load %arg16[%c0_94, %c0_95] : memref<64x32xbf16, #tpu.memory_space<vmem>>, vector<64x32xbf16>
    %cst_96 = arith.constant dense<0.000000e+00> : vector<8x32xf32>
    %228 = tpu.matmul %226, %227, %cst_96 {dimension_numbers = #tpu.dot_dimension_numbers<[1], [0], [0], [1], [0, 0, 1, 1], [], []>} : vector<8x64xbf16>, vector<64x32xbf16>, vector<8x32xf32> -> vector<8x32xf32>
    %c0_97 = arith.constant 0 : index
    %c0_98 = arith.constant 0 : index
    %229 = vector.load %arg17[%c0_97, %c0_98] : memref<1x32xf32, #tpu.memory_space<vmem>>, vector<1x32xf32>
    %230 = vector.broadcast %229 : vector<1x32xf32> to vector<8x32xf32>
    %231 = arith.addf %228, %230 : vector<8x32xf32>
    %232 = arith.addf %193, %231 : vector<8x32xf32>
    %c0_99 = arith.constant 0 : index
    %c0_100 = arith.constant 0 : index
    %c0_101 = arith.constant 0 : index
    %233 = vector.load %arg18[%c0_99, %c0_100, %c0_101] : memref<1x8x32xf32, #tpu.memory_space<vmem>>, vector<1x8x32xf32>
    %234 = vector.shape_cast %233 : vector<1x8x32xf32> to vector<8x32xf32>
    %235 = vector.shape_cast %232 : vector<8x32xf32> to vector<1x8x32xf32>
    tpu.vector_store %arg18[%c0_99, %c0_100, %c0_101], %235 {strides = array<i32>} : memref<1x8x32xf32, #tpu.memory_space<vmem>>, vector<1x8x32xf32>,
    return
  }
  func.func @transform_0(%arg0: i32) -> (i32, i32, i32) {
    %c0_i32 = arith.constant 0 : i32
    %c0_i32_0 = arith.constant 0 : i32
    %c0_i32_1 = arith.constant 0 : i32
    return %arg0, %c0_i32, %c0_i32_0 : i32, i32, i32
  }
  func.func @transform_1(%arg0: i32) -> (i32, i32) {
    %c0_i32 = arith.constant 0 : i32
    %c0_i32_0 = arith.constant 0 : i32
    %c0_i32_1 = arith.constant 0 : i32
    return %c0_i32, %c0_i32_0 : i32, i32
  }
  func.func @transform_2(%arg0: i32) -> (i32, i32) {
    %c0_i32 = arith.constant 0 : i32
    %c0_i32_0 = arith.constant 0 : i32
    %c0_i32_1 = arith.constant 0 : i32
    return %c0_i32, %c0_i32_0 : i32, i32
  }
  func.func @transform_3(%arg0: i32) -> (i32, i32) {
    %c0_i32 = arith.constant 0 : i32
    %c0_i32_0 = arith.constant 0 : i32
    %c0_i32_1 = arith.constant 0 : i32
    return %c0_i32, %c0_i32_0 : i32, i32
  }
  func.func @transform_4(%arg0: i32) -> (i32, i32) {
    %c0_i32 = arith.constant 0 : i32
    %c0_i32_0 = arith.constant 0 : i32
    %c0_i32_1 = arith.constant 0 : i32
    return %c0_i32, %c0_i32_0 : i32, i32
  }
  func.func @transform_5(%arg0: i32) -> (i32, i32) {
    %c0_i32 = arith.constant 0 : i32
    %c0_i32_0 = arith.constant 0 : i32
    %c0_i32_1 = arith.constant 0 : i32
    return %c0_i32, %c0_i32_0 : i32, i32
  }
  func.func @transform_6(%arg0: i32) -> (i32, i32) {
    %c0_i32 = arith.constant 0 : i32
    %c0_i32_0 = arith.constant 0 : i32
    %c0_i32_1 = arith.constant 0 : i32
    return %c0_i32, %c0_i32_0 : i32, i32
  }
  func.func @transform_7(%arg0: i32) -> (i32, i32) {
    %c0_i32 = arith.constant 0 : i32
    %c0_i32_0 = arith.constant 0 : i32
    %c0_i32_1 = arith.constant 0 : i32
    return %c0_i32, %c0_i32_0 : i32, i32
  }
  func.func @transform_8(%arg0: i32) -> (i32, i32) {
    %c0_i32 = arith.constant 0 : i32
    %c0_i32_0 = arith.constant 0 : i32
    %c0_i32_1 = arith.constant 0 : i32
    return %c0_i32, %c0_i32_0 : i32, i32
  }
  func.func @transform_9(%arg0: i32) -> (i32, i32) {
    %c0_i32 = arith.constant 0 : i32
    %c0_i32_0 = arith.constant 0 : i32
    %c0_i32_1 = arith.constant 0 : i32
    return %c0_i32, %c0_i32_0 : i32, i32
  }
  func.func @transform_10(%arg0: i32) -> (i32, i32) {
    %c0_i32 = arith.constant 0 : i32
    %c0_i32_0 = arith.constant 0 : i32
    %c0_i32_1 = arith.constant 0 : i32
    return %c0_i32, %c0_i32_0 : i32, i32
  }
  func.func @transform_11(%arg0: i32) -> (i32, i32) {
    %c0_i32 = arith.constant 0 : i32
    %c0_i32_0 = arith.constant 0 : i32
    %c0_i32_1 = arith.constant 0 : i32
    return %c0_i32, %c0_i32_0 : i32, i32
  }
  func.func @transform_12(%arg0: i32) -> (i32, i32) {
    %c0_i32 = arith.constant 0 : i32
    %c0_i32_0 = arith.constant 0 : i32
    %c0_i32_1 = arith.constant 0 : i32
    return %c0_i32, %c0_i32_0 : i32, i32
  }
  func.func @transform_13(%arg0: i32) -> (i32, i32) {
    %c0_i32 = arith.constant 0 : i32
    %c0_i32_0 = arith.constant 0 : i32
    %c0_i32_1 = arith.constant 0 : i32
    return %c0_i32, %c0_i32_0 : i32, i32
  }
  func.func @transform_14(%arg0: i32) -> (i32, i32) {
    %c0_i32 = arith.constant 0 : i32
    %c0_i32_0 = arith.constant 0 : i32
    %c0_i32_1 = arith.constant 0 : i32
    return %c0_i32, %c0_i32_0 : i32, i32
  }
  func.func @transform_15(%arg0: i32) -> (i32, i32) {
    %c0_i32 = arith.constant 0 : i32
    %c0_i32_0 = arith.constant 0 : i32
    %c0_i32_1 = arith.constant 0 : i32
    return %c0_i32, %c0_i32_0 : i32, i32
  }
  func.func @transform_16(%arg0: i32) -> (i32, i32) {
    %c0_i32 = arith.constant 0 : i32
    %c0_i32_0 = arith.constant 0 : i32
    %c0_i32_1 = arith.constant 0 : i32
    return %c0_i32, %c0_i32_0 : i32, i32
  }
  func.func @transform_17(%arg0: i32) -> (i32, i32, i32) {
    %c0_i32 = arith.constant 0 : i32
    %c0_i32_0 = arith.constant 0 : i32
    %c0_i32_1 = arith.constant 0 : i32
    return %arg0, %c0_i32, %c0_i32_0 : i32, i32, i32
  }
}

</mosaic_0001>

<bundles_post_ra>
// kernel: decoder_forward.5
= control target key start
LH: loop header
LB: loop body
LE: loop exit
PB: predicated region body
PF: predicated region fallthrough
CT: control target
= control target key end

     0   :  { %8 = vsyncpa [#allocation3], 0  ;;  %s845_s0 = inlined_call_operand.hbm [shape: f32[2,8,32], index: 0, kind: input, shape index: {}]   ;;  %s846_s1 = inlined_call_operand.hbm [shape: f32[1,32], index: 1, kind: input, shape index: {}]   ;;  %s847_s2 = inlined_call_operand.hbm [shape: f32[1,32], index: 2, kind: input, shape index: {}]   ;;  %s848_s3 = inlined_call_operand.hbm [shape: f32[2,8,32], index: 3, kind: output, shape index: {}]  }
   0x1   :  { %10 = vsyncpa [#allocation3 + $0x1], 0 }
   0x2   :  { %11 = vsyncpa [#allocation6], 0 }
   0x3   :  { %12 = vsyncpa [#allocation4], 0 }
   0x4   :  { %14 = vsyncpa [#allocation4 + $0x1], 0  ;;  %s616_s12 = smov 0   ;;  %s618_s13 = smov 0  }
   0x5   :  { %s620_s14 = smov 0   ;;  %s622_s15 = smov 0  }
   0x6 LB: > { %s637_s16 = sadd.s32 4294967295, %s590_s15   ;;  %s347_s17 = sadd.s32 4294967294, %s590_s15   ;;  %s590_s15 = sphi %s622_s15, %s868_s15   ;;  %s586_s14 = sphi %s620_s14, %s867_s14   ;;  %s582_s13 = sphi %s618_s13, %s866_s13   ;;  %s578_s12 = sphi %s616_s12, %s865_s12  }
   0x7   : > { %p40_p0 = scmp.ne.s32.totalorder %s582_s13, %s578_s12  ;;  %p849_p1 = scmp.eq.s32.totalorder %s637_s16, 0 }
   0x8   : > { %p112_p3 = scmp.eq.s32.totalorder %s347_s17, 1  ;;  %p348_p5 = scmp.ge.s32.totalorder %s590_s15, 1 }
   0x9   : > { %p646_p4 = por %p849_p1, %p40_p0  ;;  %p119_p7 = scmp.lt.s32.totalorder %s590_s15, 3 }
   0xa   : > { %p651_p6 = por %p112_p3, %p40_p0  ;;  %s592_s21 = smov [#allocation5]  }
   0xb   : > { %s852_s18 = scalar_select %p646_p4, 1, 0 }
   0xc   : > { %s853_s19 = scalar_select %p651_p6, 1, 0 }
   0xd   : > { %p656_p8 = pnand %p348_p5, %p119_p7  ;;  %s132_s22 = sshll.u32 %s592_s21, 4  ;;  %s133_s22 = int_to_ptr.vmem [resolvable:$true] %s132_s22 }
   0xe   : > { %s593_s23 = smov [#allocation7]   ;;  %s672_s26 = sadd.s32 1, %s590_s15  }
   0xf   : > { %s854_s20 = scalar_select %p656_p8, 1, 0 }
  0x10   : > { %p377_p10 = pneg %p656_p8  ;;  %s143_s24 = sshll.u32 %s593_s23, 4  ;;  %s669_s24 = int_to_ptr.vmem [resolvable:$true] %s143_s24 }
  0x11   : > { %s24_s27 = ssub.s32 %s590_s15, %s672_s26  ;;  %s434_s30 = scalar_lea.hbm %s846_s1, 16 }
  0x12   : > { %p665_p11 = pnand %p377_p10, %p849_p1  ;;  %p435_p12 = scmp.ne.s32.totalorder %s846_s1, %s434_s30 }
  0x13   : > { %p441_p5 = scmp.lt.u32.totalorder %s434_s30, %s846_s1 }
  0x14   : > { %p436_p13 = pneg %p665_p11 }
  0x16   : > { %p437_p0 = pnand %p436_p13, %p435_p12 }
  0x18   : > { %p438_p3 = pneg %p437_p0 }
  0x1a   : > { %p443_p7 = pnand %p441_p5, %p438_p3 }
  0x1c   : > { %446 = shalt.err (!%p443_p7)
}
  0x1d   : > { %s447_s8 = scalar_lea.vmem %s133_s22, 16  ;;  %s454_s9 = scalar_lea.vmem %s133_s22, 32 }
  0x1e   : > { %p448_p10 = scmp.ne.s32.totalorder %s133_s22, %s447_s8  ;;  %p455_p2 = scmp.lt.s32.totalorder %s133_s22, %s133_s22 }
  0x1f   : > { %p456_p6 = scmp.lt.s32.totalorder %s454_s9, %s447_s8 }
  0x20   : > { %p450_p9 = pnand %p448_p10, %p436_p13 }
  0x21   : > { %p457_p4 = por %p456_p6, %p455_p2 }
  0x22   : > { %p451_p1 = pneg %p450_p9 }
  0x24   : > { %p458_p8 = pnand %p457_p4, %p451_p1 }
  0x26   : > { %461 = shalt.err (!%p458_p8)
}
  0x27   : > { %380 = dma.hbm_to_vmem [thread:$0]  (!%p665_p11), %s846_s1, 16, %s133_s22, [#allocation6]  }
  0x28   : > { %s462_s23 = scalar_lea.hbm %s847_s2, 16 }
  0x29   : > { %p463_p9 = scmp.ne.s32.totalorder %s847_s2, %s462_s23  ;;  %p469_p4 = scmp.lt.u32.totalorder %s462_s23, %s847_s2 }
  0x2b   : > { %p465_p2 = pnand %p463_p9, %p436_p13 }
  0x2d   : > { %p466_p1 = pneg %p465_p2 }
  0x2f   : > { %p471_p6 = pnand %p469_p4, %p466_p1 }
  0x31   : > { %474 = shalt.err (!%p471_p6)
}
  0x32   : > { %s475_s22 = scalar_lea.vmem %s669_s24, 16  ;;  %s482_s5 = scalar_lea.vmem %s669_s24, 32 }
  0x33   : > { %p476_p8 = scmp.ne.s32.totalorder %s669_s24, %s475_s22  ;;  %p483_p3 = scmp.lt.s32.totalorder %s669_s24, %s669_s24 }
  0x34   : > { %p484_p5 = scmp.lt.s32.totalorder %s482_s5, %s475_s22 }
  0x35   : > { %p478_p12 = pnand %p476_p8, %p436_p13 }
  0x36   : > { %p485_p7 = por %p484_p5, %p483_p3 }
  0x37   : > { %p479_p0 = pneg %p478_p12 }
  0x39   : > { %p486_p10 = pnand %p485_p7, %p479_p0 }
  0x3b   : > { %489 = shalt.err (!%p486_p10)
}
  0x3c   : > { %383 = dma.hbm_to_vmem [thread:$0]  (!%p665_p11), %s847_s2, 16, %s669_s24, [#allocation6]  }
  0x3d   : > { %p25_p13 = scmp.eq.s32.totalorder %s24_s27, 0  ;;  %s27_s8 = sadd.s32 1, %s586_s14 }
  0x3e   : > { %p34_p9 = scmp.ne.s32.totalorder %s586_s14, %s582_s13  ;;  %p35_p2 = scmp.eq.s32.totalorder %s590_s15, 0 }
  0x3f   : > { %s732_s25 = scalar_select %p25_p13, %s586_s14, %s27_s8  }
  0x40   : > { %p36_p1 = por %p35_p2, %p34_p9  ;;  %p856_p4 = scmp.eq.s32.totalorder %s637_s16, 1 }
  0x41   : > { %p394_p8 = scmp.lt.s32.totalorder %s590_s15, 2  ;;  %s154_s10 = sand.u32 1, %s586_s14  }
  0x42   : > { %p736_p6 = por %p856_p4, %p34_p9  ;;  %s352_s11 = sshll.u32 %s154_s10, 3 }
  0x43   : > { %s353_s17 = sshll.u32 %s590_s15, 7  ;;  %s158_s27 = scalar_lea.vmem [#allocation2], %s352_s11 }
  0x44   : > { %s746_s24 = scalar_lea.hbm %s845_s0, %s353_s17  ;;  %s165_s28 = sshll.u32 %s158_s27, 4  ;;  %s748_s28 = int_to_ptr.vmem [resolvable:$true] %s165_s28 }
  0x45   : > { %p750_p11 = pnand %p394_p8, %p36_p1  ;;  %s155_s30 = scalar_lea.sflag [#allocation3], %s154_s10 }
  0x46   : > { %s490_s4 = scalar_lea.hbm %s746_s24, 128  ;;  %s495_s6 = scalar_lea.hbm %s845_s0, 256 }
  0x47   : > { %p491_p12 = scmp.ne.s32.totalorder %s746_s24, %s490_s4  ;;  %p492_p0 = pneg %p750_p11 }
  0x48   : > { %p496_p7 = scmp.lt.u32.totalorder %s746_s24, %s845_s0  ;;  %p497_p10 = scmp.lt.u32.totalorder %s495_s6, %s490_s4 }
  0x49   : > { %p493_p3 = pnand %p492_p0, %p491_p12  ;;  %p499_p9 = scmp.lt.u32.totalorder %s490_s4, %s746_s24 }
  0x4a   : > { %p498_p13 = por %p497_p10, %p496_p7 }
  0x4b   : > { %p494_p5 = pneg %p493_p3 }
  0x4c   : > { %p500_p2 = por %p499_p9, %p498_p13 }
  0x4e   : > { %p501_p1 = pnand %p500_p2, %p494_p5 }
  0x50   : > { %504 = shalt.err (!%p501_p1)
}
  0x51   : > { %s505_s10 = scalar_lea.vmem %s748_s28, 128  ;;  %s594_s11 = smov [#allocation2]  }
  0x52   : > { %p506_p4 = scmp.ne.s32.totalorder %s748_s28, %s505_s10  ;;  %s510_s17 = sshll.u32 %s594_s11, 4  ;;  %s511_s17 = int_to_ptr.vmem [resolvable:$false] %s510_s17 }
  0x53   : > { %s512_s21 = scalar_lea.vmem %s511_s17, 256  ;;  %p513_p3 = scmp.lt.s32.totalorder %s748_s28, %s511_s17 }
  0x54   : > { %p508_p8 = pnand %p506_p4, %p492_p0  ;;  %p514_p7 = scmp.lt.s32.totalorder %s512_s21, %s505_s10 }
  0x56   : > { %p509_p12 = pneg %p508_p8  ;;  %p515_p10 = por %p514_p7, %p513_p3 }
  0x58   : > { %p516_p13 = pnand %p515_p10, %p509_p12 }
  0x5a   : > { %519 = shalt.err (!%p516_p13)
}
  0x5b   : > { %387 = dma.hbm_to_vmem [thread:$0]  (!%p750_p11), %s746_s24, 128, %s748_s28, %s155_s30  }
  0x5c   : > { %p859_p5 = scmp.ne.s32.totalorder %s854_s20, 0 }
  0x5d   : > { %s782_s23 = sand.u32 (!%p859_p5), 1, %s582_s13   ;;  %p860_p0 = scmp.ne.s32.totalorder (!%p859_p5), %s852_s18, 0 }
  0x5e   : > { %174 = sbr.rel (%p859_p5) target bundleno = 433 (0x1b1), region = 32  ;;  %s355_s27 = sshll.u32 (!%p859_p5), %s782_s23, 3 }
  0x5f   : > { %s177_s4 = scalar_lea.sflag (!%p859_p5), [#allocation3], %s782_s23  ;;  %s180_s22 = scalar_lea.vmem (!%p859_p5), [#allocation2], %s355_s27 }
  0x65   : > { %565 = dma.done.wait (%p860_p0), %s177_s4, 128  }
  0x66   : > { %567 = vsyncadd (%p860_p0), %s177_s4, 4294967168  ;;  %p861_p9 = scmp.eq.s32.totalorder %s637_s16, 0 }
  0x68   : > { %569 = dma.done.wait (%p861_p9), [#allocation6], 32   ;;  %p862_p11 = pmov %p861_p9 }
  0x69   : > { %vm214_vm0 = vcmask 261120   ;;  %v211_v0 = vld [vmem:[%s180_s22] sm:$0xff]  ;;  %v359_v11 = vld [vmem:[#allocation5] ss:$0 sm:$0xff]  ;;  %v360_v13 = vld [vmem:[#allocation7] ss:$0 sm:$0xff] }
  0x6a   : > { %571 = vsyncadd (%p862_p11), [#allocation6], 4294967264  ;;  %v215_v1 = vsel %vm214_vm0, %v211_v0, 0.0  ;;  %s362_s18 = sshll.u32 %s637_s16, 7  ;;  %s210_s20 = scalar_lea.vmem [#allocation8], %s355_s27 }
  0x6b   : > { %216 = vadd.xlane.f32.xlu0 %v215_v1  ;;  %s258_s24 = sshll.u32 %s210_s20, 4  ;;  %s800_s30 = scalar_lea.hbm %s848_s3, %s362_s18  ;;  %s802_s24 = int_to_ptr.vmem [resolvable:$true] %s258_s24 }
  0x6c   : > { %s245_s5 = scalar_lea.sflag [#allocation4], %s782_s23  ;;  %s520_s6 = scalar_lea.vmem %s802_s24, 128 }
  0x6d   : > { %p521_p2 = scmp.ne.s32.totalorder %s802_s24, %s520_s6  ;;  %s595_s16 = smov [#allocation8]  }
  0x6e   : > { %s524_s7 = sshll.u32 %s595_s16, 4  ;;  %s525_s7 = int_to_ptr.vmem [resolvable:$false] %s524_s7 }
  0x6f   : > { %p522_p1 = pnand %p521_p2, %p736_p6  ;;  %s526_s8 = scalar_lea.vmem %s525_s7, 256 }
  0x70   : > { %p527_p8 = scmp.lt.s32.totalorder %s802_s24, %s525_s7  ;;  %p528_p12 = scmp.lt.s32.totalorder %s526_s8, %s520_s6 }
  0x71   : > { %p523_p4 = pneg %p522_p1 }
  0x72   : > { %p529_p3 = por %p528_p12, %p527_p8 }
  0x74   : > { %p530_p7 = pnand %p529_p3, %p523_p4 }
  0xf8   : > { %v217_v2 = vpop.xlane.xlu0 %216 }
  0xf9   : > { %v219_v3 = vmul.f32 0.03125, %v217_v2 }
  0xfb   : > { %v220_v4 = vsub.f32 %v211_v0, %v219_v3 }
  0xfd   : > { %v221_v5 = vmul.f32 %v220_v4, %v220_v4 }
  0xff   : > { %v222_v6 = vsel %vm214_vm0, %v221_v5, 0.0 }
 0x100   : > { %223 = vadd.xlane.f32.xlu0 %v222_v6 }
 0x18d   : > { %v224_v7 = vpop.xlane.xlu0 %223 }
 0x18e   : > { %v225_v8 = vmul.f32 0.03125, %v224_v7 }
 0x190   : > { %v226_v9 = vadd.f32 1e-05, %v225_v8 }
 0x192   : > { %432 = vrsqrt.f32 %v226_v9 }
 0x19c   : > { %v433_v10 = vpop.eup %432 }
 0x19d   : > { %v228_v12 = vmul.f32 %v433_v10, %v220_v4 }
 0x19f   : > { %v235_v14 = vmul.f32 %v359_v11, %v228_v12 }
 0x1a1   : > { %v242_v15 = vadd.f32 %v360_v13, %v235_v14 }
 0x1a3   : > { %243 = vst.msk [vmem:[%s210_s20] sm:$0xff] %vm214_vm0, %v242_v15 }
 0x1a4   : > { %533 = shalt.err (!%p530_p7)
}
 0x1a5   : > { %s534_s10 = scalar_lea.hbm %s800_s30, 128  ;;  %s538_s21 = scalar_lea.hbm %s848_s3, 256 }
 0x1a6   : > { %p535_p10 = scmp.ne.s32.totalorder %s800_s30, %s534_s10  ;;  %p539_p0 = scmp.lt.u32.totalorder %s800_s30, %s848_s3 }
 0x1a7   : > { %p540_p9 = scmp.lt.u32.totalorder %s538_s21, %s534_s10  ;;  %p542_p2 = scmp.lt.u32.totalorder %s534_s10, %s800_s30 }
 0x1a8   : > { %p536_p13 = pnand %p535_p10, %p736_p6 }
 0x1a9   : > { %p541_p11 = por %p540_p9, %p539_p0 }
 0x1aa   : > { %p537_p5 = pneg %p536_p13 }
 0x1ab   : > { %p543_p1 = por %p542_p2, %p541_p11 }
 0x1ad   : > { %p544_p4 = pnand %p543_p1, %p537_p5 }
 0x1af   : > { %547 = shalt.err (!%p544_p4)
}
 0x1b0   : > { %375 = dma.vmem_to_hbm [thread:$0]  (%p736_p6), %s802_s24, 128, %s800_s30, %s245_s5  }
 0x1b1 PF: > { %s270_s4 = sand.u32 1, %s578_s12   ;;  %p863_p8 = scmp.ne.s32.totalorder %s853_s19, 0 }
 0x1b2   : > { %p864_p12 = scmp.ge.s32.totalorder %s590_s15, 2  ;;  %s271_s22 = scalar_lea.sflag [#allocation4], %s270_s4 }
 0x1b4   : > { %p389_p3 = pnand %p864_p12, %p863_p8 }
 0x1b6   : > { %573 = dma.done.wait (!%p389_p3), %s271_s22, 128  }
 0x1b7   : > { %575 = vsyncadd (!%p389_p3), %s271_s22, 4294967168  ;;  %p17_p7 = scmp.ge.s32.totalorder %s672_s26, 4   ;;  %s865_s12 = smov %s582_s13 }
 0x1b8   : > { %s866_s13 = smov %s586_s14  ;;  %s867_s14 = smov %s732_s25 }
 0x1b9   : > { %s868_s15 = smov %s672_s26  ;;  %19 = sbr.rel (!%p17_p7) target bundleno = 6 (0x6), region = 85 }
 0x1c0   :  { %276 = vsyncpa [#allocation3], 1 }
 0x1c1   :  { %278 = vsyncpa [#allocation3 + $0x1], 1 }
 0x1c2   :  { %279 = vsyncpa [#allocation6], 1 }
 0x1c3   :  { %280 = vsyncpa [#allocation4], 1 }
 0x1c4   :  { %282 = vsyncpa [#allocation4 + $0x1], 1 }

// kernel: decoder_forward.3
= control target key start
LH: loop header
LB: loop body
LE: loop exit
PB: predicated region body
PF: predicated region fallthrough
CT: control target
= control target key end

     0   :  { %s4824_s0 = inlined_call_operand.hbm [shape: f32[2,8,32], index: 0, kind: input, shape index: {}, may-alias: {0,17}]   ;;  %s4825_s1 = inlined_call_operand.hbm [shape: f32[1,32], index: 1, kind: input, shape index: {}]   ;;  %s4826_s2 = inlined_call_operand.hbm [shape: f32[1,32], index: 2, kind: input, shape index: {}]   ;;  %s4827_s3 = inlined_call_operand.hbm [shape: bf16[32,96], index: 3, kind: input, shape index: {}]   ;;  %s4828_s4 = inlined_call_operand.hbm [shape: f32[1,96], index: 4, kind: input, shape index: {}]   ;;  %s4829_s5 = inlined_call_operand.hbm [shape: bf16[32,32], index: 5, kind: input, shape index: {}]   ;;  %s4830_s6 = inlined_call_operand.hbm [shape: bf16[32,64], index: 6, kind: input, shape index: {}]   ;;  %s4831_s7 = inlined_call_operand.hbm [shape: f32[1,64], index: 7, kind: input, shape index: {}]   ;;  %s4832_s8 = inlined_call_operand.hbm [shape: f32[32,128], index: 8, kind: input, shape index: {}]   ;;  %s4833_s9 = inlined_call_operand.hbm [shape: bf16[32,32], index: 9, kind: input, shape index: {}]   ;;  %s4834_s10 = inlined_call_operand.hbm [shape: f32[1,32], index: 10, kind: input, shape index: {}]   ;;  %s4835_s11 = inlined_call_operand.hbm [shape: f32[1,32], index: 11, kind: input, shape index: {}]   ;;  %s4836_s12 = inlined_call_operand.hbm [shape: f32[1,32], index: 12, kind: input, shape index: {}]   ;;  %s4837_s13 = inlined_call_operand.hbm [shape: bf16[32,64], index: 13, kind: input, shape index: {}]   ;;  %s4838_s14 = inlined_call_operand.hbm [shape: f32[1,64], index: 14, kind: input, shape index: {}]   ;;  %s4839_s15 = inlined_call_operand.hbm [shape: bf16[64,32], index: 15, kind: input, shape index: {}]   ;;  %s4840_s16 = inlined_call_operand.hbm [shape: f32[1,32], index: 16, kind: input, shape index: {}]   ;;  %s4841_s17 = inlined_call_operand.hbm [shape: f32[2,8,32], index: 17, kind: output, shape index: {}, may-alias: {0,17}]  }
   0x1   :  { %4857 = sst [smem:[#allocation47_spill]] %s4824_s0 }
   0x2   :  { %4858 = sst [smem:[#allocation48_spill]] %s4825_s1 }
   0x3   :  { %4859 = sst [smem:[#allocation49_spill]] %s4826_s2 }
   0x4   :  { %4860 = sst [smem:[#allocation50_spill]] %s4827_s3 }
   0x5   :  { %4861 = sst [smem:[#allocation51_spill]] %s4828_s4 }
   0x6   :  { %4862 = sst [smem:[#allocation52_spill]] %s4841_s17 }
   0x7   :  { %22 = vsyncpa [#allocation4], 0 }
   0x8   :  { %24 = vsyncpa [#allocation4 + $0x1], 0 }
   0x9   :  { %25 = vsyncpa [#allocation7], 0 }
   0xa   :  { %26 = vsyncpa [#allocation10], 0 }
   0xb   :  { %27 = vsyncpa [#allocation13], 0 }
   0xc   :  { %28 = vsyncpa [#allocation16], 0 }
   0xd   :  { %29 = vsyncpa [#allocation19], 0 }
   0xe   :  { %30 = vsyncpa [#allocation22], 0 }
   0xf   :  { %31 = vsyncpa [#allocation25], 0 }
  0x10   :  { %32 = vsyncpa [#allocation28], 0 }
  0x11   :  { %33 = vsyncpa [#allocation5], 0 }
  0x12   :  { %35 = vsyncpa [#allocation5 + $0x1], 0  ;;  %s4029_s24 = smov 0   ;;  %s4031_s25 = smov 0  }
  0x13   :  { %s4033_s26 = smov 0   ;;  %s4035_s27 = smov 0  }
  0x14 LB: > { %4863 = sst [smem:[#allocation41_spill]] %s3885_s24  ;;  %s3899_s28 = smov [#allocation6]   ;;  %s3897_s27 = sphi %s4035_s27, %s4420_s27   ;;  %s3893_s26 = sphi %s4033_s26, %s4918_s26   ;;  %s3889_s25 = sphi %s4031_s25, %s4917_s25   ;;  %s3885_s24 = sphi %s4029_s24, %s4916_s24  }
  0x15   : > { %4864 = sst [smem:[#allocation42_spill]] %s3889_s25  ;;  %s447_s29 = sshll.u32 %s3899_s28, 4  ;;  %s4055_s29 = int_to_ptr.vmem [resolvable:$true] %s447_s29 }
  0x16   : > { %4865 = sst [smem:[#allocation43_spill]] %s3893_s26  ;;  %s4050_s0 = sadd.s32 4294967295, %s3897_s27  }
  0x17   : > { %4866 = sst [smem:[#allocation44_spill]] %s3897_s27  ;;  %p2648_p0 = scmp.ge.s32.totalorder %s3897_s27, 1 }
  0x18   : > { %4867 = sst [smem:[#allocation45_spill]] %s4050_s0  ;;  %p4854_p1 = scmp.eq.s32.totalorder %s4050_s0, 0 }
  0x19   : > { %p434_p2 = scmp.lt.s32.totalorder %s3897_s27, 3  ;;  %s3900_s18 = smov [#allocation9]  }
  0x1a   : > { %s468_s19 = sshll.u32 %s3900_s18, 4  ;;  %s3901_s20 = smov [#allocation12]   ;;  %s4064_s19 = int_to_ptr.vmem [resolvable:$true] %s468_s19 }
  0x1b   : > { %p4057_p3 = pnand %p2648_p0, %p434_p2  ;;  %s492_s21 = sshll.u32 %s3901_s20, 4  ;;  %s4072_s21 = int_to_ptr.vmem [resolvable:$true] %s492_s21 }
  0x1c   : > { %s4871_s28 = sld [smem:[#allocation48_spill]] }
  0x1d   : > { %s4868_s30 = scalar_select %p4057_p3, 1, 0 }
  0x1e   : > { %p3126_p5 = pneg %p4057_p3 }
  0x1f   : > { %4869 = sst [smem:[#allocation46_spill]] %s4868_s30 }
  0x20   : > { %p4068_p6 = pnand %p3126_p5, %p4854_p1 }
  0x22   : > { %s3321_s17 = scalar_lea.hbm %s4871_s28, 16  ;;  %p4082_p8 = pneg %p4068_p6 }
  0x23   : > { %p3322_p7 = scmp.ne.s32.totalorder %s4871_s28, %s3321_s17  ;;  %p3328_p11 = scmp.lt.u32.totalorder %s3321_s17, %s4871_s28 }
  0x25   : > { %p3324_p9 = pnand %p4082_p8, %p3322_p7 }
  0x27   : > { %p3325_p10 = pneg %p3324_p9 }
  0x29   : > { %p3330_p12 = pnand %p3328_p11, %p3325_p10 }
  0x2b   : > { %3333 = shalt.err (!%p3330_p12)
}
  0x2c   : > { %s3334_s24 = scalar_lea.vmem %s4055_s29, 16  ;;  %s3341_s30 = scalar_lea.vmem %s4055_s29, 32 }
  0x2d   : > { %p3335_p13 = scmp.ne.s32.totalorder %s4055_s29, %s3334_s24  ;;  %p3342_p5 = scmp.lt.s32.totalorder %s4055_s29, %s4055_s29 }
  0x2e   : > { %p3343_p7 = scmp.lt.s32.totalorder %s3341_s30, %s3334_s24 }
  0x2f   : > { %p3337_p0 = pnand %p3335_p13, %p4082_p8 }
  0x30   : > { %p3344_p9 = por %p3343_p7, %p3342_p5 }
  0x31   : > { %p3338_p2 = pneg %p3337_p0 }
  0x33   : > { %p3345_p4 = pnand %p3344_p9, %p3338_p2 }
  0x35   : > { %3348 = shalt.err (!%p3345_p4)
}
  0x36   : > { %3129 = dma.hbm_to_vmem [thread:$0]  (!%p4068_p6), %s4871_s28, 16, %s4055_s29, [#allocation7]  }
  0x37   : > { %s4873_s3 = sld [smem:[#allocation50_spill]] }
  0x3d   : > { %s3349_s20 = scalar_lea.hbm %s4873_s3, 256 }
  0x3e   : > { %p3350_p10 = scmp.ne.s32.totalorder %s4873_s3, %s3349_s20  ;;  %p3356_p4 = scmp.lt.u32.totalorder %s3349_s20, %s4873_s3 }
  0x40   : > { %p3352_p11 = pnand %p3350_p10, %p4082_p8 }
  0x42   : > { %p3353_p12 = pneg %p3352_p11 }
  0x44   : > { %p3358_p13 = pnand %p3356_p4, %p3353_p12 }
  0x46   : > { %3361 = shalt.err (!%p3358_p13)
}
  0x47   : > { %s3362_s29 = scalar_lea.vmem %s4064_s19, 256  ;;  %p3370_p7 = scmp.lt.s32.totalorder %s4064_s19, %s4064_s19 }
  0x48   : > { %p3363_p0 = scmp.ne.s32.totalorder %s4064_s19, %s3362_s29  ;;  %p3371_p9 = scmp.lt.s32.totalorder %s3362_s29, %s3362_s29 }
  0x4a   : > { %p3365_p2 = pnand %p3363_p0, %p4082_p8  ;;  %p3372_p10 = por %p3371_p9, %p3370_p7 }
  0x4c   : > { %p3366_p5 = pneg %p3365_p2 }
  0x4e   : > { %p3373_p11 = pnand %p3372_p10, %p3366_p5 }
  0x50   : > { %3376 = shalt.err (!%p3373_p11)
}
  0x51   : > { %s3902_s25 = smov 64   ;;  %s3903_s26 = smov 4  }
  0x52   : > { %3135 = dma.hbm_to_vmem [thread:$0]  (!%p4068_p6), %s4873_s3, 256, %s4064_s19, [#allocation10], %s3902_s25, %s3902_s25, %s3903_s26  }
  0x53   : > { %s3377_s20 = scalar_lea.hbm %s4829_s5, 256 }
  0x54   : > { %p3378_p12 = scmp.ne.s32.totalorder %s4829_s5, %s3377_s20  ;;  %p3384_p0 = scmp.lt.u32.totalorder %s3377_s20, %s4829_s5 }
  0x56   : > { %p3380_p4 = pnand %p3378_p12, %p4082_p8 }
  0x58   : > { %p3381_p13 = pneg %p3380_p4 }
  0x5a   : > { %p3386_p2 = pnand %p3384_p0, %p3381_p13 }
  0x5c   : > { %3389 = shalt.err (!%p3386_p2)
}
  0x5d   : > { %s3390_s19 = scalar_lea.vmem %s4072_s21, 256  ;;  %p3398_p10 = scmp.lt.s32.totalorder %s4072_s21, %s4072_s21 }
  0x5e   : > { %p3391_p5 = scmp.ne.s32.totalorder %s4072_s21, %s3390_s19  ;;  %p3399_p11 = scmp.lt.s32.totalorder %s3390_s19, %s3390_s19 }
  0x60   : > { %p3393_p7 = pnand %p3391_p5, %p4082_p8  ;;  %p3400_p12 = por %p3399_p11, %p3398_p10 }
  0x62   : > { %p3394_p9 = pneg %p3393_p7 }
  0x64   : > { %p3401_p4 = pnand %p3400_p12, %p3394_p9 }
  0x66   : > { %3404 = shalt.err (!%p3401_p4)
}
  0x67   : > { %3141 = dma.hbm_to_vmem [thread:$0]  (!%p4068_p6), %s4829_s5, 256, %s4072_s21, [#allocation13], %s3902_s25, %s3902_s25, %s3903_s26  }
  0x68   : > { %s3904_s0 = smov [#allocation15]   ;;  %s3905_s23 = smov [#allocation18]  }
  0x69   : > { %s519_s22 = sshll.u32 %s3904_s0, 4  ;;  %s542_s20 = sshll.u32 %s3905_s23, 4  ;;  %s520_s22 = int_to_ptr.vmem [resolvable:$true] %s519_s22  ;;  %s543_s20 = int_to_ptr.vmem [resolvable:$true] %s542_s20 }
  0x6a   : > { %s3405_s29 = scalar_lea.hbm %s4831_s7, 16 }
  0x6b   : > { %p3406_p13 = scmp.ne.s32.totalorder %s4831_s7, %s3405_s29  ;;  %p3412_p5 = scmp.lt.u32.totalorder %s3405_s29, %s4831_s7 }
  0x6d   : > { %p3408_p0 = pnand %p3406_p13, %p4082_p8 }
  0x6f   : > { %p3409_p2 = pneg %p3408_p0 }
  0x71   : > { %p3414_p7 = pnand %p3412_p5, %p3409_p2 }
  0x73   : > { %3417 = shalt.err (!%p3414_p7)
}
  0x74   : > { %s3418_s21 = scalar_lea.vmem %s520_s22, 16  ;;  %s3425_s17 = scalar_lea.vmem %s520_s22, 32 }
  0x75   : > { %p3419_p9 = scmp.ne.s32.totalorder %s520_s22, %s3418_s21  ;;  %p3426_p12 = scmp.lt.s32.totalorder %s520_s22, %s520_s22 }
  0x76   : > { %p3427_p4 = scmp.lt.s32.totalorder %s3425_s17, %s3418_s21 }
  0x77   : > { %p3421_p10 = pnand %p3419_p9, %p4082_p8 }
  0x78   : > { %p3428_p1 = por %p3427_p4, %p3426_p12 }
  0x79   : > { %p3422_p11 = pneg %p3421_p10 }
  0x7b   : > { %p3429_p3 = pnand %p3428_p1, %p3422_p11 }
  0x7d   : > { %3432 = shalt.err (!%p3429_p3)
}
  0x7e   : > { %3147 = dma.hbm_to_vmem [thread:$0]  (!%p4068_p6), %s4831_s7, 16, %s520_s22, [#allocation16]  }
  0x7f   : > { %s3433_s24 = scalar_lea.hbm %s4833_s9, 256 }
  0x80   : > { %p3434_p13 = scmp.ne.s32.totalorder %s4833_s9, %s3433_s24  ;;  %p3440_p3 = scmp.lt.u32.totalorder %s3433_s24, %s4833_s9 }
  0x82   : > { %p3436_p0 = pnand %p3434_p13, %p4082_p8 }
  0x84   : > { %p3437_p1 = pneg %p3436_p0 }
  0x86   : > { %p3442_p2 = pnand %p3440_p3, %p3437_p1 }
  0x88   : > { %3445 = shalt.err (!%p3442_p2)
}
  0x89   : > { %s3446_s21 = scalar_lea.vmem %s543_s20, 256  ;;  %p3454_p10 = scmp.lt.s32.totalorder %s543_s20, %s543_s20 }
  0x8a   : > { %p3447_p5 = scmp.ne.s32.totalorder %s543_s20, %s3446_s21  ;;  %p3455_p11 = scmp.lt.s32.totalorder %s3446_s21, %s3446_s21 }
  0x8c   : > { %p3449_p7 = pnand %p3447_p5, %p4082_p8  ;;  %p3456_p12 = por %p3455_p11, %p3454_p10 }
  0x8e   : > { %p3450_p9 = pneg %p3449_p7 }
  0x90   : > { %p3457_p4 = pnand %p3456_p12, %p3450_p9 }
  0x92   : > { %3460 = shalt.err (!%p3457_p4)
}
  0x93   : > { %3153 = dma.hbm_to_vmem [thread:$0]  (!%p4068_p6), %s4833_s9, 256, %s543_s20, [#allocation19], %s3902_s25, %s3902_s25, %s3903_s26  }
  0x94   : > { %s3906_s3 = smov [#allocation21]   ;;  %s3907_s27 = smov [#allocation24]  }
  0x95   : > { %s567_s0 = sshll.u32 %s3906_s3, 4  ;;  %s588_s23 = sshll.u32 %s3907_s27, 4  ;;  %s568_s0 = int_to_ptr.vmem [resolvable:$true] %s567_s0  ;;  %s589_s23 = int_to_ptr.vmem [resolvable:$true] %s588_s23 }
  0x96   : > { %s3461_s29 = scalar_lea.hbm %s4835_s11, 16 }
  0x97   : > { %p3462_p13 = scmp.ne.s32.totalorder %s4835_s11, %s3461_s29  ;;  %p3468_p3 = scmp.lt.u32.totalorder %s3461_s29, %s4835_s11 }
  0x99   : > { %p3464_p0 = pnand %p3462_p13, %p4082_p8 }
  0x9b   : > { %p3465_p1 = pneg %p3464_p0 }
  0x9d   : > { %p3470_p2 = pnand %p3468_p3, %p3465_p1 }
  0x9f   : > { %3473 = shalt.err (!%p3470_p2)
}
  0xa0   : > { %s3474_s20 = scalar_lea.vmem %s568_s0, 16  ;;  %s3481_s17 = scalar_lea.vmem %s568_s0, 32 }
  0xa1   : > { %p3475_p5 = scmp.ne.s32.totalorder %s568_s0, %s3474_s20  ;;  %p3482_p10 = scmp.lt.s32.totalorder %s568_s0, %s568_s0 }
  0xa2   : > { %p3483_p11 = scmp.lt.s32.totalorder %s3481_s17, %s3474_s20 }
  0xa3   : > { %p3477_p7 = pnand %p3475_p5, %p4082_p8 }
  0xa4   : > { %p3484_p12 = por %p3483_p11, %p3482_p10 }
  0xa5   : > { %p3478_p9 = pneg %p3477_p7 }
  0xa7   : > { %p3485_p4 = pnand %p3484_p12, %p3478_p9 }
  0xa9   : > { %3488 = shalt.err (!%p3485_p4)
}
  0xaa   : > { %3159 = dma.hbm_to_vmem [thread:$0]  (!%p4068_p6), %s4835_s11, 16, %s568_s0, [#allocation22]  }
  0xab   : > { %s3489_s29 = scalar_lea.hbm %s4837_s13, 256 }
  0xac   : > { %p3490_p13 = scmp.ne.s32.totalorder %s4837_s13, %s3489_s29  ;;  %p3496_p3 = scmp.lt.u32.totalorder %s3489_s29, %s4837_s13 }
  0xae   : > { %p3492_p0 = pnand %p3490_p13, %p4082_p8 }
  0xb0   : > { %p3493_p1 = pneg %p3492_p0 }
  0xb2   : > { %p3498_p2 = pnand %p3496_p3, %p3493_p1 }
  0xb4   : > { %3501 = shalt.err (!%p3498_p2)
}
  0xb5   : > { %s3502_s20 = scalar_lea.vmem %s589_s23, 256  ;;  %p3510_p10 = scmp.lt.s32.totalorder %s589_s23, %s589_s23 }
  0xb6   : > { %p3503_p5 = scmp.ne.s32.totalorder %s589_s23, %s3502_s20  ;;  %p3511_p11 = scmp.lt.s32.totalorder %s3502_s20, %s3502_s20 }
  0xb8   : > { %p3505_p7 = pnand %p3503_p5, %p4082_p8  ;;  %p3512_p12 = por %p3511_p11, %p3510_p10 }
  0xba   : > { %p3506_p9 = pneg %p3505_p7 }
  0xbc   : > { %p3513_p4 = pnand %p3512_p12, %p3506_p9 }
  0xbe   : > { %3516 = shalt.err (!%p3513_p4)
}
  0xbf   : > { %3165 = dma.hbm_to_vmem [thread:$0]  (!%p4068_p6), %s4837_s13, 256, %s589_s23, [#allocation25], %s3902_s25, %s3902_s25, %s3903_s26  }
  0xc0   : > { %s3908_s3 = smov [#allocation27]   ;;  %s3909_s24 = smov [#allocation8]  }
  0xc1   : > { %s612_s27 = sshll.u32 %s3908_s3, 4  ;;  %s458_s30 = sshll.u32 %s3909_s24, 4  ;;  %s613_s27 = int_to_ptr.vmem [resolvable:$true] %s612_s27  ;;  %s459_s30 = int_to_ptr.vmem [resolvable:$true] %s458_s30 }
  0xc2   : > { %s3517_s28 = scalar_lea.hbm %s4839_s15, 512 }
  0xc3   : > { %p3518_p13 = scmp.ne.s32.totalorder %s4839_s15, %s3517_s28  ;;  %p3524_p3 = scmp.lt.u32.totalorder %s3517_s28, %s4839_s15 }
  0xc5   : > { %p3520_p0 = pnand %p3518_p13, %p4082_p8 }
  0xc7   : > { %p3521_p1 = pneg %p3520_p0 }
  0xc9   : > { %p3526_p2 = pnand %p3524_p3, %p3521_p1 }
  0xcb   : > { %3529 = shalt.err (!%p3526_p2)
}
  0xcc   : > { %s3530_s23 = scalar_lea.vmem %s613_s27, 512  ;;  %p3538_p10 = scmp.lt.s32.totalorder %s613_s27, %s613_s27 }
  0xcd   : > { %p3531_p5 = scmp.ne.s32.totalorder %s613_s27, %s3530_s23  ;;  %p3539_p11 = scmp.lt.s32.totalorder %s3530_s23, %s3530_s23 }
  0xcf   : > { %p3533_p7 = pnand %p3531_p5, %p4082_p8  ;;  %p3540_p12 = por %p3539_p11, %p3538_p10 }
  0xd1   : > { %p3534_p9 = pneg %p3533_p7 }
  0xd3   : > { %p3541_p4 = pnand %p3540_p12, %p3534_p9 }
  0xd5   : > { %3544 = shalt.err (!%p3541_p4)
}
  0xd6   : > { %3171 = dma.hbm_to_vmem [thread:$0]  (!%p4068_p6), %s4839_s15, 512, %s613_s27, [#allocation28], %s3902_s25, %s3902_s25, %s3903_s26  }
  0xd7   : > { %s4874_s2 = sld [smem:[#allocation49_spill]] }
  0xdd   : > { %s3545_s19 = scalar_lea.hbm %s4874_s2, 16 }
  0xde   : > { %p3546_p13 = scmp.ne.s32.totalorder %s4874_s2, %s3545_s19  ;;  %p3552_p3 = scmp.lt.u32.totalorder %s3545_s19, %s4874_s2 }
  0xe0   : > { %p3548_p0 = pnand %p3546_p13, %p4082_p8 }
  0xe2   : > { %p3549_p1 = pneg %p3548_p0 }
  0xe4   : > { %p3554_p2 = pnand %p3552_p3, %p3549_p1 }
  0xe6   : > { %3557 = shalt.err (!%p3554_p2)
}
  0xe7   : > { %s3558_s0 = scalar_lea.vmem %s459_s30, 16  ;;  %s3565_s27 = scalar_lea.vmem %s459_s30, 32 }
  0xe8   : > { %p3559_p5 = scmp.ne.s32.totalorder %s459_s30, %s3558_s0  ;;  %p3566_p10 = scmp.lt.s32.totalorder %s459_s30, %s459_s30 }
  0xe9   : > { %p3567_p11 = scmp.lt.s32.totalorder %s3565_s27, %s3558_s0 }
  0xea   : > { %p3561_p7 = pnand %p3559_p5, %p4082_p8 }
  0xeb   : > { %p3568_p12 = por %p3567_p11, %p3566_p10 }
  0xec   : > { %p3562_p9 = pneg %p3561_p7 }
  0xee   : > { %p3569_p4 = pnand %p3568_p12, %p3562_p9 }
  0xf0   : > { %3572 = shalt.err (!%p3569_p4)
}
  0xf1   : > { %3132 = dma.hbm_to_vmem [thread:$0]  (!%p4068_p6), %s4874_s2, 16, %s459_s30, [#allocation7]  }
  0xf2   : > { %s3910_s3 = smov [#allocation11]   ;;  %s3911_s29 = smov [#allocation14]  }
  0xf3   : > { %s482_s24 = sshll.u32 %s3910_s3, 4  ;;  %s505_s19 = sshll.u32 %s3911_s29, 4  ;;  %s483_s24 = int_to_ptr.vmem [resolvable:$true] %s482_s24  ;;  %s506_s19 = int_to_ptr.vmem [resolvable:$true] %s505_s19 }
  0xf4   : > { %s4875_s4 = sld [smem:[#allocation51_spill]] }
  0xfa   : > { %s3573_s22 = scalar_lea.hbm %s4875_s4, 16 }
  0xfb   : > { %p3574_p13 = scmp.ne.s32.totalorder %s4875_s4, %s3573_s22  ;;  %p3580_p3 = scmp.lt.u32.totalorder %s3573_s22, %s4875_s4 }
  0xfd   : > { %p3576_p0 = pnand %p3574_p13, %p4082_p8 }
  0xff   : > { %p3577_p1 = pneg %p3576_p0 }
 0x101   : > { %p3582_p2 = pnand %p3580_p3, %p3577_p1 }
 0x103   : > { %3585 = shalt.err (!%p3582_p2)
}
 0x104   : > { %s3586_s30 = scalar_lea.vmem %s483_s24, 16  ;;  %s3593_s17 = scalar_lea.vmem %s483_s24, 32 }
 0x105   : > { %p3587_p5 = scmp.ne.s32.totalorder %s483_s24, %s3586_s30  ;;  %p3594_p10 = scmp.lt.s32.totalorder %s483_s24, %s483_s24 }
 0x106   : > { %p3595_p11 = scmp.lt.s32.totalorder %s3593_s17, %s3586_s30 }
 0x107   : > { %p3589_p7 = pnand %p3587_p5, %p4082_p8 }
 0x108   : > { %p3596_p12 = por %p3595_p11, %p3594_p10 }
 0x109   : > { %p3590_p9 = pneg %p3589_p7 }
 0x10b   : > { %p3597_p4 = pnand %p3596_p12, %p3590_p9 }
 0x10d   : > { %3600 = shalt.err (!%p3597_p4)
}
 0x10e   : > { %3138 = dma.hbm_to_vmem [thread:$0]  (!%p4068_p6), %s4875_s4, 16, %s483_s24, [#allocation10]  }
 0x10f   : > { %s3601_s22 = scalar_lea.hbm %s4830_s6, 256 }
 0x110   : > { %p3602_p13 = scmp.ne.s32.totalorder %s4830_s6, %s3601_s22  ;;  %p3608_p3 = scmp.lt.u32.totalorder %s3601_s22, %s4830_s6 }
 0x112   : > { %p3604_p0 = pnand %p3602_p13, %p4082_p8 }
 0x114   : > { %p3605_p1 = pneg %p3604_p0 }
 0x116   : > { %p3610_p2 = pnand %p3608_p3, %p3605_p1 }
 0x118   : > { %3613 = shalt.err (!%p3610_p2)
}
 0x119   : > { %s3614_s30 = scalar_lea.vmem %s506_s19, 256  ;;  %p3622_p10 = scmp.lt.s32.totalorder %s506_s19, %s506_s19 }
 0x11a   : > { %p3615_p5 = scmp.ne.s32.totalorder %s506_s19, %s3614_s30  ;;  %p3623_p11 = scmp.lt.s32.totalorder %s3614_s30, %s3614_s30 }
 0x11c   : > { %p3617_p7 = pnand %p3615_p5, %p4082_p8  ;;  %p3624_p12 = por %p3623_p11, %p3622_p10 }
 0x11e   : > { %p3618_p9 = pneg %p3617_p7 }
 0x120   : > { %p3625_p4 = pnand %p3624_p12, %p3618_p9 }
 0x122   : > { %3628 = shalt.err (!%p3625_p4)
}
 0x123   : > { %3144 = dma.hbm_to_vmem [thread:$0]  (!%p4068_p6), %s4830_s6, 256, %s506_s19, [#allocation13], %s3902_s25, %s3902_s25, %s3903_s26  }
 0x124   : > { %s3912_s3 = smov [#allocation17]   ;;  %s3629_s22 = scalar_lea.hbm %s4832_s8, 512 }
 0x125   : > { %s529_s29 = sshll.u32 %s3912_s3, 4  ;;  %p3630_p13 = scmp.ne.s32.totalorder %s4832_s8, %s3629_s22  ;;  %s530_s29 = int_to_ptr.vmem [resolvable:$true] %s529_s29 }
 0x126   : > { %p3636_p3 = scmp.lt.u32.totalorder %s3629_s22, %s4832_s8 }
 0x127   : > { %p3632_p0 = pnand %p3630_p13, %p4082_p8 }
 0x129   : > { %p3633_p1 = pneg %p3632_p0 }
 0x12b   : > { %p3638_p2 = pnand %p3636_p3, %p3633_p1 }
 0x12d   : > { %3641 = shalt.err (!%p3638_p2)
}
 0x12e   : > { %s3642_s25 = scalar_lea.vmem %s530_s29, 512  ;;  %p3650_p10 = scmp.lt.s32.totalorder %s530_s29, %s530_s29 }
 0x12f   : > { %p3643_p5 = scmp.ne.s32.totalorder %s530_s29, %s3642_s25  ;;  %p3651_p11 = scmp.lt.s32.totalorder %s3642_s25, %s3642_s25 }
 0x131   : > { %p3645_p7 = pnand %p3643_p5, %p4082_p8  ;;  %p3652_p12 = por %p3651_p11, %p3650_p10 }
 0x133   : > { %p3646_p9 = pneg %p3645_p7 }
 0x135   : > { %p3653_p4 = pnand %p3652_p12, %p3646_p9 }
 0x137   : > { %3656 = shalt.err (!%p3653_p4)
}
 0x138   : > { %s3913_s26 = smov 128   ;;  %s3914_s19 = smov 8  }
 0x139   : > { %3150 = dma.hbm_to_vmem [thread:$0]  (!%p4068_p6), %s4832_s8, 512, %s530_s29, [#allocation16], %s3913_s26, %s3913_s26, %s3914_s19  }
 0x13a   : > { %s3915_s17 = smov [#allocation20]   ;;  %s3916_s28 = smov [#allocation23]  }
 0x13b   : > { %s556_s3 = sshll.u32 %s3915_s17, 4  ;;  %s578_s21 = sshll.u32 %s3916_s28, 4  ;;  %s557_s3 = int_to_ptr.vmem [resolvable:$true] %s556_s3  ;;  %s4330_s21 = int_to_ptr.vmem [resolvable:$true] %s578_s21 }
 0x13c   : > { %s3657_s0 = scalar_lea.hbm %s4834_s10, 16 }
 0x13d   : > { %p3658_p13 = scmp.ne.s32.totalorder %s4834_s10, %s3657_s0  ;;  %p3664_p3 = scmp.lt.u32.totalorder %s3657_s0, %s4834_s10 }
 0x13f   : > { %p3660_p0 = pnand %p3658_p13, %p4082_p8 }
 0x141   : > { %p3661_p1 = pneg %p3660_p0 }
 0x143   : > { %p3666_p2 = pnand %p3664_p3, %p3661_p1 }
 0x145   : > { %3669 = shalt.err (!%p3666_p2)
}
 0x146   : > { %s3670_s26 = scalar_lea.vmem %s557_s3, 16  ;;  %s3677_s19 = scalar_lea.vmem %s557_s3, 32 }
 0x147   : > { %p3671_p5 = scmp.ne.s32.totalorder %s557_s3, %s3670_s26  ;;  %p3678_p10 = scmp.lt.s32.totalorder %s557_s3, %s557_s3 }
 0x148   : > { %p3679_p11 = scmp.lt.s32.totalorder %s3677_s19, %s3670_s26 }
 0x149   : > { %p3673_p7 = pnand %p3671_p5, %p4082_p8 }
 0x14a   : > { %p3680_p12 = por %p3679_p11, %p3678_p10 }
 0x14b   : > { %p3674_p9 = pneg %p3673_p7 }
 0x14d   : > { %p3681_p4 = pnand %p3680_p12, %p3674_p9 }
 0x14f   : > { %3684 = shalt.err (!%p3681_p4)
}
 0x150   : > { %3156 = dma.hbm_to_vmem [thread:$0]  (!%p4068_p6), %s4834_s10, 16, %s557_s3, [#allocation19]  }
 0x151   : > { %s3685_s22 = scalar_lea.hbm %s4836_s12, 16 }
 0x152   : > { %p3686_p13 = scmp.ne.s32.totalorder %s4836_s12, %s3685_s22  ;;  %p3692_p3 = scmp.lt.u32.totalorder %s3685_s22, %s4836_s12 }
 0x154   : > { %p3688_p0 = pnand %p3686_p13, %p4082_p8 }
 0x156   : > { %p3689_p1 = pneg %p3688_p0 }
 0x158   : > { %p3694_p2 = pnand %p3692_p3, %p3689_p1 }
 0x15a   : > { %3697 = shalt.err (!%p3694_p2)
}
 0x15b   : > { %s3698_s3 = scalar_lea.vmem %s4330_s21, 16  ;;  %s3705_s25 = scalar_lea.vmem %s4330_s21, 32 }
 0x15c   : > { %p3699_p5 = scmp.ne.s32.totalorder %s4330_s21, %s3698_s3  ;;  %p3706_p10 = scmp.lt.s32.totalorder %s4330_s21, %s4330_s21 }
 0x15d   : > { %p3707_p11 = scmp.lt.s32.totalorder %s3705_s25, %s3698_s3 }
 0x15e   : > { %p3701_p7 = pnand %p3699_p5, %p4082_p8 }
 0x15f   : > { %p3708_p12 = por %p3707_p11, %p3706_p10 }
 0x160   : > { %p3702_p9 = pneg %p3701_p7 }
 0x162   : > { %p3709_p4 = pnand %p3708_p12, %p3702_p9 }
 0x164   : > { %3712 = shalt.err (!%p3709_p4)
}
 0x165   : > { %3162 = dma.hbm_to_vmem [thread:$0]  (!%p4068_p6), %s4836_s12, 16, %s4330_s21, [#allocation22]  }
 0x166   : > { %s3917_s19 = smov [#allocation26]   ;;  %s3918_s24 = smov [#allocation29]  }
 0x167   : > { %s602_s30 = sshll.u32 %s3917_s19, 4  ;;  %s626_s17 = sshll.u32 %s3918_s24, 4  ;;  %s603_s30 = int_to_ptr.vmem [resolvable:$true] %s602_s30  ;;  %s4374_s17 = int_to_ptr.vmem [resolvable:$true] %s626_s17 }
 0x168   : > { %s3713_s20 = scalar_lea.hbm %s4838_s14, 16 }
 0x169   : > { %p3714_p13 = scmp.ne.s32.totalorder %s4838_s14, %s3713_s20  ;;  %p3720_p3 = scmp.lt.u32.totalorder %s3713_s20, %s4838_s14 }
 0x16b   : > { %p3716_p0 = pnand %p3714_p13, %p4082_p8 }
 0x16d   : > { %p3717_p1 = pneg %p3716_p0 }
 0x16f   : > { %p3722_p2 = pnand %p3720_p3, %p3717_p1 }
 0x171   : > { %3725 = shalt.err (!%p3722_p2)
}
 0x172   : > { %s3726_s3 = scalar_lea.vmem %s603_s30, 16  ;;  %s3733_s25 = scalar_lea.vmem %s603_s30, 32 }
 0x173   : > { %p3727_p5 = scmp.ne.s32.totalorder %s603_s30, %s3726_s3  ;;  %p3734_p10 = scmp.lt.s32.totalorder %s603_s30, %s603_s30 }
 0x174   : > { %p3735_p11 = scmp.lt.s32.totalorder %s3733_s25, %s3726_s3 }
 0x175   : > { %p3729_p7 = pnand %p3727_p5, %p4082_p8 }
 0x176   : > { %p3736_p12 = por %p3735_p11, %p3734_p10 }
 0x177   : > { %p3730_p9 = pneg %p3729_p7 }
 0x179   : > { %p3737_p4 = pnand %p3736_p12, %p3730_p9 }
 0x17b   : > { %3740 = shalt.err (!%p3737_p4)
}
 0x17c   : > { %3168 = dma.hbm_to_vmem [thread:$0]  (!%p4068_p6), %s4838_s14, 16, %s603_s30, [#allocation25]  }
 0x17d   : > { %s3741_s28 = scalar_lea.hbm %s4840_s16, 16 }
 0x17e   : > { %p3742_p13 = scmp.ne.s32.totalorder %s4840_s16, %s3741_s28  ;;  %p3748_p3 = scmp.lt.u32.totalorder %s3741_s28, %s4840_s16 }
 0x180   : > { %p3744_p0 = pnand %p3742_p13, %p4082_p8 }
 0x182   : > { %p3745_p1 = pneg %p3744_p0 }
 0x184   : > { %p3750_p2 = pnand %p3748_p3, %p3745_p1 }
 0x186   : > { %3753 = shalt.err (!%p3750_p2)
}
 0x187   : > { %s3754_s30 = scalar_lea.vmem %s4374_s17, 16  ;;  %s3761_s23 = scalar_lea.vmem %s4374_s17, 32 }
 0x188   : > { %p3755_p5 = scmp.ne.s32.totalorder %s4374_s17, %s3754_s30  ;;  %p3762_p10 = scmp.lt.s32.totalorder %s4374_s17, %s4374_s17 }
 0x189   : > { %p3763_p11 = scmp.lt.s32.totalorder %s3761_s23, %s3754_s30 }
 0x18a   : > { %p3757_p7 = pnand %p3755_p5, %p4082_p8 }
 0x18b   : > { %p3764_p12 = por %p3763_p11, %p3762_p10 }
 0x18c   : > { %p3758_p9 = pneg %p3757_p7 }
 0x18e   : > { %p3765_p4 = pnand %p3764_p12, %p3758_p9 }
 0x190   : > { %3768 = shalt.err (!%p3765_p4)
}
 0x191   : > { %s4876_s25 = sld [smem:[#allocation44_spill]]  ;;  %s4877_s29 = sld [smem:[#allocation43_spill]] }
 0x192   : > { %s4878_s18 = sld [smem:[#allocation42_spill]]  ;;  %s4879_s26 = sld [smem:[#allocation41_spill]] }
 0x193   : > { %s4880_s19 = sld [smem:[#allocation45_spill]] }
 0x194   : > { %3174 = dma.hbm_to_vmem [thread:$0]  (!%p4068_p6), %s4840_s16, 16, %s4374_s17, [#allocation28]  }
 0x197   : > { %s2647_s1 = sadd.s32 4294967294, %s4876_s25   ;;  %s4420_s27 = sadd.s32 1, %s4876_s25  }
 0x198   : > { %s45_s24 = ssub.s32 %s4876_s25, %s4420_s27  ;;  %s48_s28 = sadd.s32 1, %s4877_s29 }
 0x199   : > { %p46_p8 = scmp.eq.s32.totalorder %s45_s24, 0  ;;  %p55_p13 = scmp.ne.s32.totalorder %s4877_s29, %s4878_s18 }
 0x19a   : > { %p56_p0 = scmp.eq.s32.totalorder %s4876_s25, 0  ;;  %p61_p1 = scmp.ne.s32.totalorder %s4878_s18, %s4879_s26 }
 0x19b   : > { %s4431_s22 = scalar_select %p46_p8, %s4877_s29, %s48_s28  }
 0x19c   : > { %p4433_p3 = por %p56_p0, %p55_p13  ;;  %p4882_p2 = scmp.eq.s32.totalorder %s4880_s19, 0 }
 0x19d   : > { %p421_p5 = scmp.eq.s32.totalorder %s4880_s19, 1  ;;  %p427_p7 = scmp.eq.s32.totalorder %s2647_s1, 1 }
 0x19e   : > { %p4439_p6 = por %p4882_p2, %p61_p1  ;;  %p3199_p9 = scmp.lt.s32.totalorder %s4876_s25, 2 }
 0x19f   : > { %s637_s0 = sand.u32 1, %s4877_s29   ;;  %p4446_p10 = por %p421_p5, %p55_p13 }
 0x1a0   : > { %p4450_p11 = por %p427_p7, %p61_p1  ;;  %s2666_s21 = sshll.u32 %s637_s0, 3 }
 0x1a1   : > { %s4884_s30 = scalar_select %p4446_p10, 1, 0 }
 0x1a2   : > { %s4885_s23 = scalar_select %p4450_p11, 1, 0 }
 0x1a3   : > { %s2667_s3 = sshll.u32 %s4876_s25, 7  ;;  %s4886_s24 = sld [smem:[#allocation47_spill]] }
 0x1a4   : > { %s641_s29 = scalar_lea.vmem [#allocation3], %s2666_s21  ;;  %p4464_p12 = pnand %p3199_p9, %p4433_p3 }
 0x1a5   : > { %s648_s19 = sshll.u32 %s641_s29, 4  ;;  %s638_s25 = scalar_lea.sflag [#allocation4], %s637_s0  ;;  %s4460_s19 = int_to_ptr.vmem [resolvable:$true] %s648_s19 }
 0x1a6   : > { %p3771_p8 = pneg %p4464_p12 }
 0x1a9   : > { %s4887_s28 = smov %s4886_s24  ;;  %s4458_s2 = scalar_lea.hbm %s4886_s24, %s2667_s3 }
 0x1aa   : > { %s3769_s4 = scalar_lea.hbm %s4458_s2, 128  ;;  %s3774_s18 = scalar_lea.hbm %s4887_s28, 256 }
 0x1ab   : > { %p3770_p4 = scmp.ne.s32.totalorder %s4458_s2, %s3769_s4  ;;  %p3775_p1 = scmp.lt.u32.totalorder %s4458_s2, %s4887_s28 }
 0x1ac   : > { %p3776_p3 = scmp.lt.u32.totalorder %s3774_s18, %s3769_s4  ;;  %p3778_p5 = scmp.lt.u32.totalorder %s3769_s4, %s4458_s2 }
 0x1ad   : > { %p3772_p13 = pnand %p3771_p8, %p3770_p4 }
 0x1ae   : > { %p3777_p2 = por %p3776_p3, %p3775_p1 }
 0x1af   : > { %p3773_p0 = pneg %p3772_p13 }
 0x1b0   : > { %p3779_p7 = por %p3778_p5, %p3777_p2 }
 0x1b2   : > { %p3780_p9 = pnand %p3779_p7, %p3773_p0 }
 0x1b4   : > { %3783 = shalt.err (!%p3780_p9)
}
 0x1b5   : > { %s3784_s0 = scalar_lea.vmem %s4460_s19, 128  ;;  %s3919_s24 = smov [#allocation3]  }
 0x1b6   : > { %p3785_p4 = scmp.ne.s32.totalorder %s4460_s19, %s3784_s0  ;;  %s3789_s29 = sshll.u32 %s3919_s24, 4  ;;  %s3790_s29 = int_to_ptr.vmem [resolvable:$false] %s3789_s29 }
 0x1b7   : > { %s3791_s21 = scalar_lea.vmem %s3790_s29, 256  ;;  %p3792_p10 = scmp.lt.s32.totalorder %s4460_s19, %s3790_s29 }
 0x1b8   : > { %p3787_p13 = pnand %p3785_p4, %p3771_p8  ;;  %p3793_p1 = scmp.lt.s32.totalorder %s3791_s21, %s3784_s0 }
 0x1ba   : > { %p3788_p11 = pneg %p3787_p13  ;;  %p3794_p3 = por %p3793_p1, %p3792_p10 }
 0x1bc   : > { %p3795_p2 = pnand %p3794_p3, %p3788_p11 }
 0x1be   : > { %3798 = shalt.err (!%p3795_p2)
}
 0x1bf   : > { %3178 = dma.hbm_to_vmem [thread:$0]  (!%p4464_p12), %s4458_s2, 128, %s4460_s19, %s638_s25  }
 0x1c0   : > { %s4889_s4 = sld [smem:[#allocation46_spill]] }
 0x1c6   : > { %p4890_p0 = scmp.ne.s32.totalorder %s4889_s4, 0 }
 0x1c7   : > { %s4891_s3 = sld [smem:[#allocation42_spill]] (!%p4890_p0) }
 0x1c8   : > { %657 = sbr.rel (%p4890_p0) target bundleno = 6033 (0x1791), region = 88 }
 0x1cd   : > { %s4496_s18 = sand.u32 (!%p4890_p0), 1, %s4891_s3  }
 0x1ce   : > { %s2669_s20 = sshll.u32 (!%p4890_p0), %s4496_s18, 3  ;;  %s660_s26 = scalar_lea.sflag (!%p4890_p0), [#allocation4], %s4496_s18 }
 0x1cf   : > { %s663_s0 = scalar_lea.vmem [#allocation3], %s2669_s20 }
 0x1d0   : > { %3844 = dma.done.wait (%p4439_p6), %s660_s26, 128  }
 0x1d1   : > { %3846 = vsyncadd (%p4439_p6), %s660_s26, 4294967168  ;;  %s4892_s2 = sld [smem:[#allocation45_spill]] }
 0x1d7   : > { %p4893_p10 = scmp.eq.s32.totalorder %s4892_s2, 0 }
 0x1d9   : > { %3848 = dma.done.wait (%p4893_p10), [#allocation7], 32   ;;  %p4894_p11 = pmov %p4893_p10 }
 0x1da   : > { %p4895_p12 = pmov %p4893_p10 }
 0x1db   : > { %3850 = vsyncadd (%p4894_p11), [#allocation7], 4294967264 }
 0x1dc   : > { %3852 = dma.done.wait (%p4895_p12), [#allocation10], 272   ;;  %p4896_p8 = pmov %p4893_p10 }
 0x1de   : > { %3854 = vsyncadd (%p4896_p8), [#allocation10], 4294967024  ;;  %p4897_p5 = pmov %p4896_p8 }
 0x1e0   : > { %3856 = dma.done.wait (%p4897_p5), [#allocation13], 512   ;;  %p4898_p7 = pmov %p4897_p5 }
 0x1e1   : > { %p4899_p6 = pmov %p4897_p5 }
 0x1e2   : > { %3858 = vsyncadd (%p4898_p7), [#allocation13], 4294966784 }
 0x1e3   : > { %3860 = dma.done.wait (%p4899_p6), [#allocation16], 528   ;;  %p4900_p9 = pmov %p4897_p5 }
 0x1e4   : > { %p4901_p4 = pmov %p4897_p5 }
 0x1e5   : > { %3862 = vsyncadd (%p4900_p9), [#allocation16], 4294966768 }
 0x1e6   : > { %3864 = dma.done.wait (%p4901_p4), [#allocation19], 272   ;;  %p4902_p13 = pmov %p4901_p4 }
 0x1e7   : > { %p4903_p1 = pmov %p4901_p4 }
 0x1e8   : > { %3866 = vsyncadd (%p4902_p13), [#allocation19], 4294967024 }
 0x1e9   : > { %3868 = dma.done.wait (%p4903_p1), [#allocation22], 32   ;;  %p4904_p3 = pmov %p4903_p1 }
 0x1ea   : > { %p4905_p2 = pmov %p4903_p1 }
 0x1eb   : > { %3870 = vsyncadd (%p4904_p3), [#allocation22], 4294967264 }
 0x1ec   : > { %3872 = dma.done.wait (%p4905_p2), [#allocation25], 272   ;;  %p4906_p0 = pmov %p4903_p1 }
 0x1ee   : > { %3874 = vsyncadd (%p4906_p0), [#allocation25], 4294967024  ;;  %p4907_p10 = pmov %p4906_p0 }
 0x1ef   : > { %p4908_p11 = pmov %p4906_p0 }
 0x1f0   : > { %3876 = dma.done.wait (%p4907_p10), [#allocation28], 528  }
 0x1f1   : > { %3878 = vsyncadd (%p4908_p11), [#allocation28], 4294966768  ;;  %vm782_vm0 = vcmask 261120   ;;  %v4538_v0 = vld [vmem:[%s663_s0] sm:$0xff]  ;;  %v3287_v7 = vld [vmem:[#allocation9] sm:$0xff]   ;;  %v3920_v8 = vmov 0.0  }
 0x1f2   : > { %v783_v1 = vsel %vm782_vm0, %v4538_v0, 0.0  ;;  %2818 = vmatprep.subr.bf16.mxu1 %v3920_v8  ;;  %vm3921_vm1 = vmmov 0   ;;  %v3288_v9 = vld [vmem:[#allocation9 + $0x8] sm:$0xff]   ;;  %2834 = vmatprep.subr.bf16.mxu0 %v3920_v8  ;;  %v2687_v15 = vld [vmem:[#allocation6] ss:$0 sm:$0xff]  ;;  %v3291_v20 = vld [vmem:[#allocation12] sm:$0xff]  }
 0x1f3   : > { %784 = vadd.xlane.f32.xlu0 %v783_v1  ;;  %2822 = vmatprep.mubr.msk.bf16.mxu1 %vm3921_vm1, %v3920_v8  ;;  %v3289_v10 = vld [vmem:[#allocation14] sm:$0xff]   ;;  %v2688_v17 = vld [vmem:[#allocation8] ss:$0 sm:$0xff]  ;;  %v3290_v22 = vld [vmem:[#allocation14 + $0x8] sm:$0xff]   ;;  %s3922_s17 = smov 96   ;;  %v3923_v51 = vmov 0.0|0.0  }
 0x1f4   : > { %2819 = vmatpush3.bf16.msra.mxu1 %v3287_v7  ;;  %2838 = vmatprep.mubr.msk.bf16.mxu0 %vm3921_vm1, %v3920_v8  ;;  %v3292_v23 = vld [vmem:[#allocation12 + $0x8] sm:$0xff]   ;;  %v2689_v24 = vld [vmem:[#allocation11] ss:$0 sm:$0xff]  ;;  %v2693_v31 = vld [vmem:[#allocation15] ss:$0 sm:$0xff]  ;;  %vm999_vm2 = vcmask 64512  }
 0x1f5   : > { %2820 = vmatprep.subr.bf16.mxu1 %v3920_v8  ;;  %v970_v48 = vld [vmem:[#allocation17] sm:$0xff]  ;;  %v971_v49 = vld [vmem:[#allocation17 + $0x8] sm:$0xff]  ;;  %v972_v50 = vld [vmem:[#allocation17 + $0x10] sm:$0xff]  ;;  %s3924_s19 = smov 256   ;;  %s3925_s1 = smov 64   ;;  %vm1232_vm4 = vcmask 1043456  }
 0x1f6   : > { %v4570_v52 = vpack.c.bf16 %v971_v49, %v970_v48  ;;  %v973_v53 = vld [vmem:[#allocation17 + $0x18] sm:$0xff]  ;;  %s3926_s25 = smov 88   ;;  %s3927_s24 = smov 120   ;;  %vm1571_vm5 = vcmask 130112   ;;  %vm1864_vm6 = vcmask 195712   ;;  %vm2157_vm7 = vcmask 261312  }
 0x1f7   : > { %v4573_v54 = vpack.c.bf16 %v973_v53, %v972_v50  ;;  %s3928_s29 = smov 80   ;;  %s3929_s21 = smov 112   ;;  %vm2365_vm8 = vcmask 523264  }
 0x1f8   : > { %2821 = vmatpush3.bf16.msra.mxu1 %v3288_v9  ;;  %s3930_s4 = smov 56   ;;  %s3931_s3 = smov 72  }
 0x1f9   : > { %2826 = vmatprep.subr.bf16.mxu1 %v3289_v10  ;;  %s3932_s26 = smov 104   ;;  %s3933_s0 = smov 48  }
 0x1fa   : > { %p4911_p8 = scmp.ne.s32.totalorder %s4884_s30, 0 }
 0x280   : > { %v785_v2 = vpop.xlane.xlu0 %784 }
 0x281   : > { %v787_v3 = vmul.f32 0.03125, %v785_v2 }
 0x283   : > { %v788_v4 = vsub.f32 %v4538_v0, %v787_v3 }
 0x285   : > { %v789_v5 = vmul.f32 %v788_v4, %v788_v4 }
 0x287   : > { %v790_v6 = vsel %vm782_vm0, %v789_v5, 0.0 }
 0x288   : > { %791 = vadd.xlane.f32.xlu0 %v790_v6 }
 0x315   : > { %v792_v11 = vpop.xlane.xlu0 %791 }
 0x316   : > { %v793_v12 = vmul.f32 0.03125, %v792_v11 }
 0x318   : > { %v794_v13 = vadd.f32 1e-05, %v793_v12 }
 0x31a   : > { %3301 = vrsqrt.f32 %v794_v13  ;;  %v974_v13 = vlaneseq }
 0x324   : > { %v3302_v14 = vpop.eup %3301 }
 0x325   : > { %v796_v16 = vmul.f32 %v3302_v14, %v788_v4  ;;  %v4611_v14 = vshrl.u32 %v974_v13, 7 }
 0x327   : > { %v803_v18 = vmul.f32 %v2687_v15, %v796_v16  ;;  %v4613_v15 = vand.u32 127, %v974_v13 }
 0x329   : > { %v810_v19 = vadd.f32 %v2688_v17, %v803_v18  ;;  %vm978_vm3 = vcmp.le.s32.totalorder %v4613_v15, %v4611_v14 }
 0x32b   : > { %v811_v21 = vpack.c.bf16 %v810_v19, %v810_v19 }
 0x32d   : > { %2823 = vmatmul.mubr.msk.bf16.vlgmr.msra.gmra.mrb[0].mxu1 %vm782_vm0, %v811_v21 }
 0x32e   : > { %2827 = vmatpush3.bf16.msra.mxu1 %v3289_v10  ;;  %2830 = vmatprep.mubr.msk.bf16.mxu1 %vm782_vm0, %v3291_v20 }
 0x32f   : > { %2828 = vmatprep.subr.bf16.mxu1 %v3290_v22 }
 0x332   : > { %2829 = vmatpush3.bf16.msra.mxu1 %v3290_v22 }
 0x333   : > { %3018 = vmatprep.subr.bf16.mxu1 %v3923_v51 }
 0x335   : > { %2831 = vmatmul.mubr.msk.bf16.vlgmr.msra.gmra.mrb[4].mxu1 %vm782_vm0, %v3292_v23 }
 0x336   : > { %2858 = vmatprep.mubr.msk.f32.mxu1 %vm3921_vm1, %v3920_v8  ;;  %3020 = vmatpush3.bf16.msra.mxu1 %v4570_v52 }
 0x337   : > { %3021 = vmatprep.subr.bf16.mxu1 %v3923_v51 }
 0x33a   : > { %3023 = vmatpush3.bf16.msra.mxu1 %v4573_v54 }
 0x33b   : > { %2861 = vmatprep.subr.bf16.mxu1 %v3920_v8 }
 0x400   : > { %v872_v25 = vpop.f32.mrb[0].mxu1 }
 0x401   : > { %v873_v26 = vadd.f32 %v2689_v24, %v872_v25  ;;  %v2824_v27 = vpop.f32.mrb[1].mxu1 }
 0x402   : > { %v875_v28 = vpop.f32.mrb[2].mxu1 }
 0x403   : > { %v4556_v29 = vpack.c.bf16 %v873_v26, %v873_v26  ;;  %v2825_v30 = vpop.f32.mrb[3].mxu1  ;;  %v979_v62 = vmul.f32 0.20412415, %v873_v26 }
 0x405   : > { %991 = vrot.lane.b32.xlu0 %v4556_v29, %s3922_s17  ;;  %v4591_v63 = vpack.c.bf16 %v979_v62, %v979_v62 }
 0x408   : > { %v2832_v32 = vpop.f32.mrb[4].mxu1 }
 0x409   : > { %v964_v33 = vadd.f32 %v2832_v32, %v2693_v31  ;;  %v955_v34 = vpop.f32.mrb[5].mxu1 }
 0x40a   : > { %v956_v35 = vadd.f32 %v2693_v31, %v955_v34  ;;  %v2833_v36 = vpop.f32.mrb[6].mxu1 }
 0x40b   : > { %v967_v37 = vadd.f32 %v2833_v36, %v2693_v31  ;;  %v958_v38 = vpop.f32.mrb[7].mxu1  ;;  %v986_v40 = vmul.f32 0.20412415, %v964_v33 }
 0x40c   : > { %v959_v39 = vadd.f32 %v2693_v31, %v958_v38  ;;  %v984_v43 = vmul.f32 0.20412415, %v956_v35 }
 0x40d   : > { %v4559_v41 = vpack.c.bf16 %v967_v37, %v964_v33  ;;  %v987_v42 = vmul.f32 0.20412415, %v967_v37 }
 0x40e   : > { %v4561_v44 = vpack.c.bf16 %v959_v39, %v956_v35  ;;  %v985_v45 = vmul.f32 0.20412415, %v959_v39 }
 0x40f   : > { %v4563_v46 = vpack.c.bf16 %v987_v42, %v986_v40  ;;  %v1056_v61 = vsel %vm999_vm2, %v4559_v41, 0 }
 0x410   : > { %v4565_v47 = vpack.c.bf16 %v985_v45, %v984_v43  ;;  %v1053_v60 = vsel %vm999_vm2, %v4561_v44, 0 }
 0x412   : > { %995 = vrot.lane.b32.xlu1 %v4565_v47, %s3922_s17 }
 0x416   : > { %997 = vrot.lane.b32.xlu1 %v4563_v46, %s3922_s17  ;;  %s3934_s17 = smov 8  }
 0x477   : > { %v992_v59 = vpop.permute.xlu0 %991 }
 0x478   : > { %v1001_v2 = vsel %vm999_vm2, %v992_v59, 0 }
 0x484   : > { %v996_v55 = vpop.permute.xlu1 %995 }
 0x485   : > { %v1004_v56 = vsel %vm999_vm2, %v996_v55, 0 }
 0x486   : > { %2835 = vmatpush3.bf16.xpose.msra.mxu0 %v1004_v56 }
 0x487   : > { %2836 = vmatprep.subr.bf16.mxu0 %v3920_v8 }
 0x488   : > { %v998_v57 = vpop.permute.xlu1 %997 }
 0x489   : > { %v1007_v58 = vsel %vm999_vm2, %v998_v57, 0 }
 0x48e   : > { %2837 = vmatpush3.bf16.xpose.msra.mxu0 %v1007_v58 }
 0x48f   : > { %2842 = vmatprep.subr.bf16.mxu0 %v3920_v8 }
 0x495   : > { %2839 = vmatmul.mubr.msk.bf16.vlgmr.msra.gmra.mrb[0].mxu0 %vm999_vm2, %v992_v59 }
 0x496   : > { %2843 = vmatpush3.bf16.xpose.msra.mxu0 %v1053_v60  ;;  %2846 = vmatprep.mubr.msk.bf16.mxu0 %vm3921_vm1, %v3920_v8 }
 0x497   : > { %2844 = vmatprep.subr.bf16.mxu0 %v3920_v8 }
 0x49e   : > { %2845 = vmatpush3.bf16.xpose.msra.mxu0 %v1056_v61 }
 0x49f   : > { %3024 = vmatprep.subr.bf16.mxu0 %v3923_v51 }
 0x4a5   : > { %2847 = vmatmul.mubr.msk.bf16.vlgmr.msra.gmra.mrb[0].mxu0 %vm999_vm2, %v4591_v63 }
 0x4a6   : > { %3026 = vmatpush3.bf16.msra.mxu0 %v4570_v52  ;;  %2897 = vmatprep.mubr.msk.f32.mxu0 %vm3921_vm1, %v3920_v8 }
 0x4a7   : > { %3027 = vmatprep.subr.bf16.mxu0 %v3923_v51 }
 0x4aa   : > { %3029 = vmatpush3.bf16.msra.mxu0 %v4573_v54 }
 0x4ab   : > { %2900 = vmatprep.subr.bf16.mxu0 %v3920_v8 }
 0x578   : > { %v1092_v1 = vpop.f32.mrb[0].mxu0 }
 0x579   : > { %v2848_v3 = vpop.f32.mrb[1].mxu0  ;;  %2859 = vmatmul.mubr.msk.f32.vlgmr.msra.gmra.mrb[8].mxu1 %vm782_vm0, %v1092_v1 }
 0x57a   : > { %2862 = vmatpush3.bf16.xpose.msra.mxu1 %v1001_v2  ;;  %v1095_v4 = vpop.f32.mrb[2].mxu0  ;;  %2863 = vmatprep.mubr.msk.bf16.mxu1 %vm3921_vm1, %v3920_v8 }
 0x57b   : > { %v2849_v5 = vpop.f32.mrb[3].mxu0  ;;  %2867 = vmatprep.subr.bf16.mxu1 %v3920_v8 }
 0x581   : > { %2864 = vmatmul.mubr.msk.bf16.vlgmr.msra.gmra.mrb[12].mxu1 %vm999_vm2, %v4591_v63 }
 0x582   : > { %2869 = vmatprep.mubr.msk.bf16.mxu1 %vm3921_vm1, %v3920_v8 }
 0x64c   : > { %v1167_v6 = vpop.f32.mrb[8].mxu1 }
 0x64d   : > { %1172 = vrot.lane.b32.xlu1 %v1167_v6, %s3924_s19  ;;  %v2860_v7 = vpop.f32.mrb[9].mxu1 }
 0x654   : > { %v1208_v9 = vpop.f32.mrb[12].mxu1 }
 0x655   : > { %v2865_v10 = vpop.f32.mrb[13].mxu1 }
 0x656   : > { %v1211_v11 = vpop.f32.mrb[14].mxu1 }
 0x657   : > { %v2866_v12 = vpop.f32.mrb[15].mxu1 }
 0x6bf   : > { %v1173_v16 = vpop.permute.xlu1 %1172 }
 0x6c0   : > { %v1209_v17 = vadd.f32 %v1208_v9, %v1173_v16 }
 0x6c2   : > { %v1214_v18 = vsel %vm978_vm3, %v1209_v17, -1e+30 }
 0x6c3   : > { %v1215_v19 = vsel %vm999_vm2, %v1214_v18, -inf }
 0x6c4   : > { %1216 = vmax.xlane.f32.xlu1 %v1215_v19 }
 0x6d5   : > { %1227 = vrot.lane.b32.xlu1 %v4556_v29, %s3925_s1  ;;  %s3935_s1 = smov 16  }
 0x6d9   : > { %1281 = vrot.lane.b32.xlu1 %v4563_v46, %s3926_s25 }
 0x6dd   : > { %1337 = vrot.lane.b32.xlu1 %v4561_v44, %s3927_s24 }
 0x6e1   : > { %1277 = vrot.lane.b32.xlu1 %v4556_v29, %s3926_s25 }
 0x6e5   : > { %1339 = vrot.lane.b32.xlu1 %v4559_v41, %s3927_s24 }
 0x6e9   : > { %1333 = vrot.lane.b32.xlu1 %v4591_v63, %s3927_s24  ;;  %s2737_s24 = sshll.u32 %s4892_s2, 7  ;;  %s2412_s2 = scalar_lea.sflag [#allocation5], %s4496_s18 }
 0x751   : > { %v1217_v20 = vpop.xlane.xlu1 %1216 }
 0x752   : > { %v1218_v21 = vsub.f32 %v1214_v18, %v1217_v20 }
 0x754   : > { %v1219_v22 = vmul.f32 1.442695, %v1218_v21 }
 0x755   : > { %v1228_v23 = vpop.permute.xlu1 %1227 }
 0x756   : > { %3303 = vpow2.f32 %v1219_v22  ;;  %v1234_v24 = vsel %vm1232_vm4, %v1228_v23, 0 }
 0x757   : > { %2868 = vmatpush3.bf16.msra.mxu1 %v1234_v24 }
 0x758   : > { %2873 = vmatprep.subr.bf16.mxu1 %v3920_v8 }
 0x759   : > { %v1282_v34 = vpop.permute.xlu1 %1281 }
 0x75a   : > { %v1290_v35 = vsel %vm999_vm2, %v1282_v34, 0 }
 0x75d   : > { %v1338_v36 = vpop.permute.xlu1 %1337 }
 0x75e   : > { %v1345_v38 = vsel %vm999_vm2, %v1338_v36, 0 }
 0x760   : > { %v3304_v25 = vpop.eup %3303 }
 0x761   : > { %v1221_v26 = vsel %vm999_vm2, %v3304_v25, 0.0  ;;  %v1278_v37 = vpop.permute.xlu1 %1277 }
 0x762   : > { %1222 = vadd.xlane.f32.xlu0 %v1221_v26  ;;  %v1284_v53 = vsel %vm999_vm2, %v1278_v37, 0 }
 0x765   : > { %v1340_v39 = vpop.permute.xlu1 %1339 }
 0x766   : > { %v1348_v40 = vsel %vm999_vm2, %v1340_v39, 0 }
 0x769   : > { %v1334_v42 = vpop.permute.xlu1 %1333 }
 0x778   : > { %1279 = vrot.lane.b32.xlu0 %v4565_v47, %s3926_s25  ;;  %s3937_s25 = smov 24  }
 0x7ef   : > { %v1223_v27 = vpop.xlane.xlu0 %1222 }
 0x7f0   : > { %3305 = vrcp.f32 %v1223_v27 }
 0x7f3   : > { %v1280_v31 = vpop.permute.xlu0 %1279 }
 0x7f4   : > { %v1287_v33 = vsel %vm999_vm2, %v1280_v31, 0 }
 0x7fa   : > { %v3306_v28 = vpop.eup %3305 }
 0x7fb   : > { %v1225_v30 = vmul.f32 %v3306_v28, %v3304_v25 }
 0x7fd   : > { %v1226_v32 = vpack.c.bf16 %v1225_v30, %v1225_v30 }
 0x7ff   : > { %2870 = vmatmul.mubr.msk.bf16.vlgmr.msra.gmra.mrb[16].mxu1 %vm999_vm2, %v1226_v32 }
 0x800   : > { %2874 = vmatpush3.bf16.xpose.msra.mxu1 %v1287_v33  ;;  %2877 = vmatprep.mubr.msk.bf16.mxu1 %vm3921_vm1, %v3920_v8 }
 0x801   : > { %2875 = vmatprep.subr.bf16.mxu1 %v3920_v8 }
 0x808   : > { %2876 = vmatpush3.bf16.xpose.msra.mxu1 %v1290_v35 }
 0x809   : > { %2881 = vmatprep.subr.bf16.mxu1 %v3920_v8 }
 0x80f   : > { %2878 = vmatmul.mubr.msk.bf16.vlgmr.msra.gmra.mrb[20].mxu1 %vm999_vm2, %v1278_v37 }
 0x810   : > { %2882 = vmatpush3.bf16.xpose.msra.mxu1 %v1345_v38  ;;  %2885 = vmatprep.mubr.msk.bf16.mxu1 %vm3921_vm1, %v3920_v8 }
 0x811   : > { %2883 = vmatprep.subr.bf16.mxu1 %v3920_v8 }
 0x818   : > { %2884 = vmatpush3.bf16.xpose.msra.mxu1 %v1348_v40 }
 0x819   : > { %3030 = vmatprep.subr.bf16.mxu1 %v3923_v51 }
 0x81f   : > { %2886 = vmatmul.mubr.msk.bf16.vlgmr.msra.gmra.mrb[20].mxu1 %vm999_vm2, %v1334_v42 }
 0x820   : > { %3032 = vmatpush3.bf16.msra.mxu1 %v4570_v52  ;;  %2936 = vmatprep.mubr.msk.f32.mxu1 %vm3921_vm1, %v3920_v8 }
 0x821   : > { %3033 = vmatprep.subr.bf16.mxu1 %v3923_v51 }
 0x824   : > { %3035 = vmatpush3.bf16.msra.mxu1 %v4573_v54 }
 0x825   : > { %2939 = vmatprep.subr.bf16.mxu1 %v3920_v8 }
 0x8d2   : > { %v1270_v43 = vpop.f32.mrb[16].mxu1 }
 0x8d3   : > { %1276 = vst.msk [vmem:[#allocation2] sm:$0xff] %vm999_vm2, %v1270_v43  ;;  %v2871_v45 = vpop.f32.mrb[17].mxu1 }
 0x8d4   : > { %v1273_v48 = vpop.f32.mrb[18].mxu1 }
 0x8d5   : > { %v2872_v49 = vpop.f32.mrb[19].mxu1 }
 0x8f2   : > { %v1384_v50 = vpop.f32.mrb[20].mxu1 }
 0x8f3   : > { %v2887_v55 = vpop.f32.mrb[21].mxu1  ;;  %2898 = vmatmul.mubr.msk.f32.vlgmr.msra.gmra.mrb[4].mxu0 %vm782_vm0, %v1384_v50 }
 0x8f4   : > { %2901 = vmatpush3.bf16.xpose.msra.mxu0 %v1284_v53  ;;  %v1387_v56 = vpop.f32.mrb[22].mxu1  ;;  %2902 = vmatprep.mubr.msk.bf16.mxu0 %vm3921_vm1, %v3920_v8 }
 0x8f5   : > { %v2888_v57 = vpop.f32.mrb[23].mxu1  ;;  %2906 = vmatprep.subr.bf16.mxu0 %v3920_v8 }
 0x8fb   : > { %2903 = vmatmul.mubr.msk.bf16.vlgmr.msra.gmra.mrb[8].mxu0 %vm999_vm2, %v1334_v42 }
 0x8fc   : > { %2908 = vmatprep.mubr.msk.bf16.mxu0 %vm3921_vm1, %v3920_v8 }
 0x9c6   : > { %v1459_v58 = vpop.f32.mrb[4].mxu0 }
 0x9c7   : > { %1464 = vrot.lane.b32.xlu0 %v1459_v58, %s3924_s19  ;;  %v2899_v59 = vpop.f32.mrb[5].mxu0 }
 0x9ce   : > { %v1500_v60 = vpop.f32.mrb[8].mxu0 }
 0x9cf   : > { %v2904_v61 = vpop.f32.mrb[9].mxu0 }
 0x9d0   : > { %v1503_v62 = vpop.f32.mrb[10].mxu0 }
 0x9d1   : > { %v2905_v1 = vpop.f32.mrb[11].mxu0 }
 0xa39   : > { %v1465_v2 = vpop.permute.xlu0 %1464 }
 0xa3a   : > { %v1501_v3 = vadd.f32 %v1500_v60, %v1465_v2 }
 0xa3c   : > { %v1506_v4 = vsel %vm978_vm3, %v1501_v3, -1e+30 }
 0xa3d   : > { %v1507_v5 = vsel %vm999_vm2, %v1506_v4, -inf }
 0xa3e   : > { %1508 = vmax.xlane.f32.xlu1 %v1507_v5 }
 0xa4f   : > { %1575 = vrot.lane.b32.xlu1 %v4565_v47, %s3928_s29 }
 0xa53   : > { %1577 = vrot.lane.b32.xlu1 %v4563_v46, %s3928_s29 }
 0xa57   : > { %1573 = vrot.lane.b32.xlu1 %v4556_v29, %s3928_s29  ;;  %s777_s29 = scalar_lea.vmem [#allocation30], %s2669_s20 }
 0xa5b   : > { %1628 = vrot.lane.b32.xlu1 %v4591_v63, %s3929_s21 }
 0xacb   : > { %v1509_v6 = vpop.xlane.xlu1 %1508 }
 0xacc   : > { %v1510_v7 = vsub.f32 %v1506_v4, %v1509_v6 }
 0xace   : > { %v1511_v9 = vmul.f32 1.442695, %v1510_v7 }
 0xacf   : > { %v1576_v19 = vpop.permute.xlu1 %1575 }
 0xad0   : > { %3307 = vpow2.f32 %v1511_v9  ;;  %v1583_v21 = vsel %vm999_vm2, %v1576_v19, 0 }
 0xad3   : > { %v1578_v22 = vpop.permute.xlu1 %1577 }
 0xad4   : > { %v1586_v23 = vsel %vm999_vm2, %v1578_v22, 0 }
 0xad7   : > { %v1574_v25 = vpop.permute.xlu1 %1573 }
 0xad8   : > { %v1580_v36 = vsel %vm999_vm2, %v1574_v25, 0 }
 0xada   : > { %v3308_v10 = vpop.eup %3307 }
 0xadb   : > { %v1513_v11 = vsel %vm999_vm2, %v3308_v10, 0.0  ;;  %v1629_v30 = vpop.permute.xlu1 %1628 }
 0xadc   : > { %1514 = vadd.xlane.f32.xlu0 %v1513_v11 }
 0xaf2   : > { %1519 = vrot.lane.b32.xlu0 %v4556_v29, %s3930_s4 }
 0xaf6   : > { %1630 = vrot.lane.b32.xlu0 %v4561_v44, %s3929_s21 }
 0xafa   : > { %1632 = vrot.lane.b32.xlu0 %v4559_v41, %s3929_s21  ;;  %s2425_s21 = sshll.u32 %s777_s29, 4  ;;  %s4781_s21 = int_to_ptr.vmem [resolvable:$true] %s2425_s21 }
 0xafb   : > { %s3799_s20 = scalar_lea.vmem %s4781_s21, 128 }
 0xafc   : > { %p3800_p12 = scmp.ne.s32.totalorder %s4781_s21, %s3799_s20 }
 0xafe   : > { %p3801_p5 = pnand %p3800_p12, %p4911_p8 }
 0xb00   : > { %p3802_p7 = pneg %p3801_p5 }
 0xb69   : > { %v1515_v12 = vpop.xlane.xlu0 %1514 }
 0xb6a   : > { %3309 = vrcp.f32 %v1515_v12 }
 0xb6d   : > { %v1520_v13 = vpop.permute.xlu0 %1519 }
 0xb6e   : > { %v1525_v16 = vsel %vm1232_vm4, %v1520_v13, 0 }
 0xb6f   : > { %2907 = vmatpush3.bf16.msra.mxu0 %v1525_v16 }
 0xb70   : > { %2912 = vmatprep.subr.bf16.mxu0 %v3920_v8 }
 0xb71   : > { %v1631_v24 = vpop.permute.xlu0 %1630 }
 0xb72   : > { %v1638_v26 = vsel %vm999_vm2, %v1631_v24, 0 }
 0xb74   : > { %v3310_v17 = vpop.eup %3309 }
 0xb75   : > { %v1517_v18 = vmul.f32 %v3310_v17, %v3308_v10  ;;  %v1633_v27 = vpop.permute.xlu0 %1632 }
 0xb76   : > { %v1641_v28 = vsel %vm999_vm2, %v1633_v27, 0 }
 0xb77   : > { %v1518_v20 = vpack.c.bf16 %v1517_v18, %v1517_v18 }
 0xb79   : > { %2909 = vmatmul.mubr.msk.bf16.vlgmr.msra.gmra.mrb[12].mxu0 %vm999_vm2, %v1518_v20 }
 0xb7a   : > { %2913 = vmatpush3.bf16.xpose.msra.mxu0 %v1583_v21  ;;  %2916 = vmatprep.mubr.msk.bf16.mxu0 %vm3921_vm1, %v3920_v8 }
 0xb7b   : > { %2914 = vmatprep.subr.bf16.mxu0 %v3920_v8 }
 0xb82   : > { %2915 = vmatpush3.bf16.xpose.msra.mxu0 %v1586_v23 }
 0xb83   : > { %2920 = vmatprep.subr.bf16.mxu0 %v3920_v8 }
 0xb89   : > { %2917 = vmatmul.mubr.msk.bf16.vlgmr.msra.gmra.mrb[16].mxu0 %vm999_vm2, %v1574_v25 }
 0xb8a   : > { %2921 = vmatpush3.bf16.xpose.msra.mxu0 %v1638_v26  ;;  %2924 = vmatprep.mubr.msk.bf16.mxu0 %vm3921_vm1, %v3920_v8 }
 0xb8b   : > { %2922 = vmatprep.subr.bf16.mxu0 %v3920_v8 }
 0xb92   : > { %2923 = vmatpush3.bf16.xpose.msra.mxu0 %v1641_v28 }
 0xb93   : > { %3036 = vmatprep.subr.bf16.mxu0 %v3923_v51 }
 0xb99   : > { %2925 = vmatmul.mubr.msk.bf16.vlgmr.msra.gmra.mrb[16].mxu0 %vm999_vm2, %v1629_v30 }
 0xb9a   : > { %3038 = vmatpush3.bf16.msra.mxu0 %v4570_v52  ;;  %2975 = vmatprep.mubr.msk.f32.mxu0 %vm3921_vm1, %v3920_v8 }
 0xb9b   : > { %3039 = vmatprep.subr.bf16.mxu0 %v3923_v51 }
 0xb9e   : > { %3041 = vmatpush3.bf16.msra.mxu0 %v4573_v54 }
 0xb9f   : > { %2978 = vmatprep.subr.bf16.mxu0 %v3920_v8 }
 0xc4c   : > { %v4697_v31 = vpop.f32.mrb[12].mxu0 }
 0xc4d   : > { %v2910_v32 = vpop.f32.mrb[13].mxu0 }
 0xc4e   : > { %v1564_v33 = vpop.f32.mrb[14].mxu0 }
 0xc4f   : > { %v2911_v34 = vpop.f32.mrb[15].mxu0 }
 0xc6c   : > { %v1677_v35 = vpop.f32.mrb[16].mxu0 }
 0xc6d   : > { %v2926_v37 = vpop.f32.mrb[17].mxu0  ;;  %2937 = vmatmul.mubr.msk.f32.vlgmr.msra.gmra.mrb[10].mxu1 %vm782_vm0, %v1677_v35 }
 0xc6e   : > { %2940 = vmatpush3.bf16.xpose.msra.mxu1 %v1580_v36  ;;  %v1680_v52 = vpop.f32.mrb[18].mxu0  ;;  %2941 = vmatprep.mubr.msk.bf16.mxu1 %vm3921_vm1, %v3920_v8 }
 0xc6f   : > { %v2927_v51 = vpop.f32.mrb[19].mxu0  ;;  %2945 = vmatprep.subr.bf16.mxu1 %v3920_v8 }
 0xc75   : > { %2942 = vmatmul.mubr.msk.bf16.vlgmr.msra.gmra.mrb[24].mxu1 %vm999_vm2, %v1629_v30 }
 0xc76   : > { %2947 = vmatprep.mubr.msk.bf16.mxu1 %vm3921_vm1, %v3920_v8 }
 0xd40   : > { %v1752_v54 = vpop.f32.mrb[10].mxu1 }
 0xd41   : > { %1757 = vrot.lane.b32.xlu0 %v1752_v54, %s3924_s19  ;;  %v2938_v38 = vpop.f32.mrb[11].mxu1 }
 0xd48   : > { %v1793_v39 = vpop.f32.mrb[24].mxu1 }
 0xd49   : > { %v2943_v40 = vpop.f32.mrb[25].mxu1 }
 0xd4a   : > { %v1796_v42 = vpop.f32.mrb[26].mxu1  ;;  %v3294_v40 = vld [vmem:[#allocation18 + $0x8] sm:$0xff]  }
 0xd4b   : > { %v2944_v43 = vpop.f32.mrb[27].mxu1 }
 0xdb3   : > { %v1758_v45 = vpop.permute.xlu0 %1757 }
 0xdb4   : > { %v1794_v48 = vadd.f32 %v1793_v39, %v1758_v45  ;;  %v3293_v39 = vld [vmem:[#allocation18] sm:$0xff]  }
 0xdb6   : > { %v1799_v49 = vsel %vm978_vm3, %v1794_v48, -1e+30 }
 0xdb7   : > { %v1800_v50 = vsel %vm999_vm2, %v1799_v49, -inf }
 0xdb8   : > { %1801 = vmax.xlane.f32.xlu1 %v1800_v50 }
 0xdc9   : > { %1868 = vrot.lane.b32.xlu1 %v4565_v47, %s3931_s3 }
 0xdcd   : > { %1870 = vrot.lane.b32.xlu1 %v4563_v46, %s3931_s3 }
 0xdd1   : > { %1866 = vrot.lane.b32.xlu1 %v4556_v29, %s3931_s3 }
 0xdd5   : > { %1921 = vrot.lane.b32.xlu1 %v4591_v63, %s3932_s26 }
 0xe45   : > { %v1802_v53 = vpop.xlane.xlu1 %1801 }
 0xe46   : > { %v1803_v55 = vsub.f32 %v1799_v49, %v1802_v53  ;;  %v2720_v53 = vld [vmem:[#allocation20] ss:$0 sm:$0xff] }
 0xe48   : > { %v1804_v56 = vmul.f32 1.442695, %v1803_v55 }
 0xe49   : > { %v1869_v61 = vpop.permute.xlu1 %1868 }
 0xe4a   : > { %3311 = vpow2.f32 %v1804_v56  ;;  %v1876_v1 = vsel %vm999_vm2, %v1869_v61, 0 }
 0xe54   : > { %v3312_v57 = vpop.eup %3311 }
 0xe55   : > { %v1806_v58 = vsel %vm999_vm2, %v3312_v57, 0.0 }
 0xe56   : > { %1807 = vadd.xlane.f32.xlu0 %v1806_v58 }
 0xe6c   : > { %1812 = vrot.lane.b32.xlu0 %v4556_v29, %s3933_s0 }
 0xe70   : > { %1923 = vrot.lane.b32.xlu0 %v4561_v44, %s3932_s26 }
 0xe74   : > { %1925 = vrot.lane.b32.xlu0 %v4559_v41, %s3932_s26  ;;  %v1871_v41 = vpop.permute.xlu1 %1870  ;;  %s4909_s26 = sld [smem:[#allocation52_spill]] }
 0xe75   : > { %v1879_v44 = vsel %vm999_vm2, %v1871_v41, 0  ;;  %v3295_v41 = vld [vmem:[#allocation24] sm:$0xff]  }
 0xe78   : > { %v1867_v3 = vpop.permute.xlu1 %1866 }
 0xe79   : > { %v1873_v16 = vsel %vm999_vm2, %v1867_v3, 0 }
 0xe7a   : > { %s4910_s0 = smov %s4909_s26 }
 0xe7c   : > { %v1922_v7 = vpop.permute.xlu1 %1921 }
 0xee3   : > { %v1808_v46 = vpop.xlane.xlu0 %1807 }
 0xee4   : > { %3313 = vrcp.f32 %v1808_v46 }
 0xee7   : > { %v1813_v47 = vpop.permute.xlu0 %1812 }
 0xee8   : > { %v1818_v63 = vsel %vm1232_vm4, %v1813_v47, 0 }
 0xee9   : > { %2946 = vmatpush3.bf16.msra.mxu1 %v1818_v63 }
 0xeea   : > { %2951 = vmatprep.subr.bf16.mxu1 %v3920_v8 }
 0xeeb   : > { %v1924_v2 = vpop.permute.xlu0 %1923 }
 0xeec   : > { %v1931_v4 = vsel %vm999_vm2, %v1924_v2, 0  ;;  %v3297_v2 = vld [vmem:[#allocation27] sm:$0xff]  }
 0xeee   : > { %v3314_v59 = vpop.eup %3313 }
 0xeef   : > { %v1810_v60 = vmul.f32 %v3314_v59, %v3312_v57  ;;  %v1926_v5 = vpop.permute.xlu0 %1925 }
 0xef0   : > { %v1934_v6 = vsel %vm999_vm2, %v1926_v5, 0 }
 0xef1   : > { %v1811_v62 = vpack.c.bf16 %v1810_v60, %v1810_v60 }
 0xef3   : > { %2948 = vmatmul.mubr.msk.bf16.vlgmr.msra.gmra.mrb[28].mxu1 %vm999_vm2, %v1811_v62 }
 0xef4   : > { %2952 = vmatpush3.bf16.xpose.msra.mxu1 %v1876_v1  ;;  %2955 = vmatprep.mubr.msk.bf16.mxu1 %vm3921_vm1, %v3920_v8 }
 0xef5   : > { %2953 = vmatprep.subr.bf16.mxu1 %v3920_v8 }
 0xefc   : > { %2954 = vmatpush3.bf16.xpose.msra.mxu1 %v1879_v44  ;;  %v3296_v44 = vld [vmem:[#allocation24 + $0x8] sm:$0xff]  }
 0xefd   : > { %2959 = vmatprep.subr.bf16.mxu1 %v3920_v8 }
 0xf03   : > { %2956 = vmatmul.mubr.msk.bf16.vlgmr.msra.gmra.mrb[32].mxu1 %vm999_vm2, %v1867_v3 }
 0xf04   : > { %2960 = vmatpush3.bf16.xpose.msra.mxu1 %v1931_v4  ;;  %2963 = vmatprep.mubr.msk.bf16.mxu1 %vm3921_vm1, %v3920_v8 }
 0xf05   : > { %2961 = vmatprep.subr.bf16.mxu1 %v3920_v8 }
 0xf0c   : > { %2962 = vmatpush3.bf16.xpose.msra.mxu1 %v1934_v6 }
 0xf0d   : > { %2998 = vmatprep.subr.bf16.mxu1 %v3920_v8 }
 0xf13   : > { %2964 = vmatmul.mubr.msk.bf16.vlgmr.msra.gmra.mrb[32].mxu1 %vm999_vm2, %v1922_v7 }
 0xf14   : > { %3002 = vmatprep.mubr.msk.bf16.mxu1 %vm3921_vm1, %v3920_v8  ;;  %2999 = vmatpush3.bf16.msra.mxu1 %v3295_v41 }
 0xf15   : > { %3000 = vmatprep.subr.bf16.mxu1 %v3920_v8 }
 0xf18   : > { %3001 = vmatpush3.bf16.msra.mxu1 %v3296_v44 }
 0xfc6   : > { %v1854_v9 = vpop.f32.mrb[28].mxu1 }
 0xfc7   : > { %v2949_v10 = vpop.f32.mrb[29].mxu1 }
 0xfc8   : > { %v1857_v11 = vpop.f32.mrb[30].mxu1  ;;  %v2725_v10 = vld [vmem:[#allocation23] ss:$0 sm:$0xff] }
 0xfc9   : > { %v2950_v12 = vpop.f32.mrb[31].mxu1 }
 0xfe6   : > { %v1970_v13 = vpop.f32.mrb[32].mxu1 }
 0xfe7   : > { %v2965_v17 = vpop.f32.mrb[33].mxu1  ;;  %2976 = vmatmul.mubr.msk.f32.vlgmr.msra.gmra.mrb[6].mxu0 %vm782_vm0, %v1970_v13 }
 0xfe8   : > { %2979 = vmatpush3.bf16.xpose.msra.mxu0 %v1873_v16  ;;  %v1973_v18 = vpop.f32.mrb[34].mxu1  ;;  %2980 = vmatprep.mubr.msk.bf16.mxu0 %vm3921_vm1, %v3920_v8  ;;  %v3299_v16 = vld [vmem:[#allocation27 + $0x10] sm:$0xff]   ;;  %v3300_v17 = vld [vmem:[#allocation27 + $0x18] sm:$0xff]  }
 0xfe9   : > { %v2966_v19 = vpop.f32.mrb[35].mxu1  ;;  %2984 = vmatprep.subr.bf16.mxu0 %v3920_v8  ;;  %v2726_v18 = vld [vmem:[#allocation26] ss:$0 sm:$0xff] }
 0xfef   : > { %2981 = vmatmul.mubr.msk.bf16.vlgmr.msra.gmra.mrb[20].mxu0 %vm999_vm2, %v1922_v7  ;;  %v2724_v7 = vld [vmem:[#allocation21] ss:$0 sm:$0xff] }
 0xff0   : > { %2986 = vmatprep.mubr.msk.bf16.mxu0 %vm3921_vm1, %v3920_v8 }
0x10ba   : > { %v2045_v20 = vpop.f32.mrb[6].mxu0 }
0x10bb   : > { %2050 = vrot.lane.b32.xlu0 %v2045_v20, %s3924_s19  ;;  %v2977_v21 = vpop.f32.mrb[7].mxu0  ;;  %s3936_s19 = smov 40  }
0x10c2   : > { %v2086_v22 = vpop.f32.mrb[20].mxu0 }
0x10c3   : > { %v2982_v23 = vpop.f32.mrb[21].mxu0 }
0x10c4   : > { %v2089_v24 = vpop.f32.mrb[22].mxu0 }
0x10c5   : > { %v2983_v25 = vpop.f32.mrb[23].mxu0 }
0x112d   : > { %v2051_v26 = vpop.permute.xlu0 %2050 }
0x112e   : > { %v2087_v27 = vadd.f32 %v2086_v22, %v2051_v26  ;;  %v2730_v26 = vld [vmem:[#allocation29] ss:$0 sm:$0xff] }
0x1130   : > { %v2092_v28 = vsel %vm978_vm3, %v2087_v27, -1e+30 }
0x1131   : > { %v2093_v30 = vsel %vm999_vm2, %v2092_v28, -inf }
0x1132   : > { %2094 = vmax.xlane.f32.xlu1 %v2093_v30 }
0x1143   : > { %1568 = vrot.lane.b32.xlu1 %v4697_v31, %s3934_s17  ;;  %s4779_s17 = scalar_lea.hbm %s4909_s26, %s2737_s24 }
0x1147   : > { %1861 = vrot.lane.b32.xlu1 %v1854_v9, %s3935_s1  ;;  %s3938_s1 = smov [#allocation30]  }
0x11bf   : > { %v2095_v32 = vpop.xlane.xlu1 %2094 }
0x11c0   : > { %v2096_v33 = vsub.f32 %v2092_v28, %v2095_v32 }
0x11c2   : > { %v2097_v34 = vmul.f32 1.442695, %v2096_v33 }
0x11c3   : > { %v1569_v35 = vpop.permute.xlu1 %1568 }
0x11c4   : > { %3315 = vpow2.f32 %v2097_v34  ;;  %1572 = vst.msk [vmem:[#allocation2] sm:$0xff] %vm1571_vm5, %v1569_v35 }
0x11c7   : > { %v1862_v36 = vpop.permute.xlu1 %1861 }
0x11c8   : > { %1865 = vst.msk [vmem:[#allocation2] sm:$0xff] %vm1864_vm6, %v1862_v36 }
0x11ce   : > { %v3316_v14 = vpop.eup %3315 }
0x11cf   : > { %v2099_v15 = vsel %vm999_vm2, %v3316_v14, 0.0 }
0x11d0   : > { %2100 = vadd.xlane.f32.xlu0 %v2099_v15 }
0x11e6   : > { %2105 = vrot.lane.b32.xlu0 %v4556_v29, %s3936_s19  ;;  %s3803_s19 = sshll.u32 %s3938_s1, 4  ;;  %s3804_s19 = int_to_ptr.vmem [resolvable:$false] %s3803_s19 }
0x11e7   : > { %p3806_p6 = scmp.lt.s32.totalorder %s4781_s21, %s3804_s19 }
0x125d   : > { %v2101_v31 = vpop.xlane.xlu0 %2100 }
0x125e   : > { %3317 = vrcp.f32 %v2101_v31 }
0x1261   : > { %v2106_v37 = vpop.permute.xlu0 %2105 }
0x1262   : > { %v2111_v52 = vsel %vm1232_vm4, %v2106_v37, 0 }
0x1263   : > { %2985 = vmatpush3.bf16.msra.mxu0 %v2111_v52 }
0x1264   : > { %2990 = vmatprep.subr.bf16.mxu0 %v3920_v8 }
0x1268   : > { %v3318_v51 = vpop.eup %3317 }
0x1269   : > { %v2103_v54 = vmul.f32 %v3318_v51, %v3316_v14 }
0x126b   : > { %v2104_v38 = vpack.c.bf16 %v2103_v54, %v2103_v54 }
0x126d   : > { %2987 = vmatmul.mubr.msk.bf16.vlgmr.msra.gmra.mrb[24].mxu0 %vm999_vm2, %v2104_v38 }
0x126e   : > { %2994 = vmatprep.mubr.msk.bf16.mxu0 %vm3921_vm1, %v3920_v8  ;;  %2991 = vmatpush3.bf16.msra.mxu0 %v3293_v39 }
0x126f   : > { %2992 = vmatprep.subr.bf16.mxu0 %v3920_v8 }
0x1272   : > { %2993 = vmatpush3.bf16.msra.mxu0 %v3294_v40 }
0x1273   : > { %3006 = vmatprep.subr.bf16.mxu0 %v3920_v8 }
0x1340   : > { %v2147_v29 = vpop.f32.mrb[24].mxu0 }
0x1341   : > { %2154 = vrot.lane.b32.xlu0 %v2147_v29, %s3937_s25  ;;  %v2988_v42 = vpop.f32.mrb[25].mxu0  ;;  %s3805_s25 = scalar_lea.vmem %s3804_s19, 256 }
0x1342   : > { %v2150_v43 = vpop.f32.mrb[26].mxu0  ;;  %p3807_p9 = scmp.lt.s32.totalorder %s3805_s25, %s3799_s20 }
0x1343   : > { %v2989_v45 = vpop.f32.mrb[27].mxu0 }
0x1344   : > { %p3808_p4 = por %p3807_p9, %p3806_p6 }
0x1346   : > { %p3809_p13 = pnand %p3808_p4, %p3802_p7 }
0x13b3   : > { %v2155_v48 = vpop.permute.xlu0 %2154 }
0x13b4   : > { %2158 = vst.msk [vmem:[#allocation2] sm:$0xff] %vm2157_vm7, %v2155_v48 }
0x13bb   : > { %v2159_v49 = vld [vmem:[#allocation2] sm:$0xff] }
0x13bc   : > { %v2160_v50 = vpack.c.bf16 %v2159_v49, %v2159_v49 }
0x13be   : > { %2995 = vmatmul.mubr.msk.bf16.vlgmr.msra.gmra.mrb[28].mxu0 %vm782_vm0, %v2160_v50 }
0x13bf   : > { %3014 = vmatprep.mubr.msk.bf16.mxu0 %vm3921_vm1, %v3920_v8  ;;  %3007 = vmatpush3.bf16.msra.mxu0 %v3297_v2 }
0x13c0   : > { %3008 = vmatprep.subr.bf16.mxu0 %v3920_v8 }
0x1491   : > { %v2221_v55 = vpop.f32.mrb[28].mxu0 }
0x1492   : > { %v2222_v56 = vadd.f32 %v2720_v53, %v2221_v55  ;;  %v2996_v57 = vpop.f32.mrb[29].mxu0 }
0x1493   : > { %v2224_v58 = vpop.f32.mrb[30].mxu0 }
0x1494   : > { %v2227_v46 = vadd.f32 %v2222_v56, %v4538_v0  ;;  %v2997_v47 = vpop.f32.mrb[31].mxu0  ;;  %v3298_v0 = vld [vmem:[#allocation27 + $0x8] sm:$0xff]  }
0x1495   : > { %3009 = vmatpush3.bf16.msra.mxu0 %v3298_v0 }
0x1496   : > { %v2230_v63 = vsel %vm782_vm0, %v2227_v46, 0.0  ;;  %3010 = vmatprep.subr.bf16.mxu0 %v3920_v8 }
0x1497   : > { %2231 = vadd.xlane.f32.xlu1 %v2230_v63 }
0x1499   : > { %3011 = vmatpush3.bf16.msra.mxu0 %v3299_v16 }
0x149a   : > { %3012 = vmatprep.subr.bf16.mxu0 %v3920_v8 }
0x149d   : > { %3013 = vmatpush3.bf16.msra.mxu0 %v3300_v17 }
0x1524   : > { %v2232_v59 = vpop.xlane.xlu1 %2231 }
0x1525   : > { %v2233_v60 = vmul.f32 0.03125, %v2232_v59 }
0x1527   : > { %v2234_v61 = vsub.f32 %v2227_v46, %v2233_v60 }
0x1529   : > { %v2235_v62 = vmul.f32 %v2234_v61, %v2234_v61 }
0x152b   : > { %v2236_v1 = vsel %vm782_vm0, %v2235_v62, 0.0 }
0x152c   : > { %2237 = vadd.xlane.f32.xlu0 %v2236_v1 }
0x15b9   : > { %v2238_v3 = vpop.xlane.xlu0 %2237 }
0x15ba   : > { %v2239_v4 = vmul.f32 0.03125, %v2238_v3 }
0x15bc   : > { %v2240_v5 = vadd.f32 1e-05, %v2239_v4 }
0x15be   : > { %3319 = vrsqrt.f32 %v2240_v5 }
0x15c8   : > { %v3320_v6 = vpop.eup %3319 }
0x15c9   : > { %v2242_v9 = vmul.f32 %v3320_v6, %v2234_v61 }
0x15cb   : > { %v2249_v11 = vmul.f32 %v2724_v7, %v2242_v9 }
0x15cd   : > { %v2256_v12 = vadd.f32 %v2725_v10, %v2249_v11 }
0x15cf   : > { %v2257_v13 = vpack.c.bf16 %v2256_v12, %v2256_v12 }
0x15d1   : > { %3003 = vmatmul.mubr.msk.bf16.vlgmr.msra.gmra.mrb[36].mxu1 %vm782_vm0, %v2257_v13 }
0x16a4   : > { %v2318_v19 = vpop.f32.mrb[36].mxu1 }
0x16a5   : > { %v2319_v20 = vadd.f32 %v2726_v18, %v2318_v19  ;;  %v3004_v21 = vpop.f32.mrb[37].mxu1 }
0x16a6   : > { %v2321_v22 = vpop.f32.mrb[38].mxu1 }
0x16a7   : > { %v2324_v23 = vmax.f32 %v2319_v20, 0.0  ;;  %v3005_v24 = vpop.f32.mrb[39].mxu1 }
0x16a9   : > { %v2325_v25 = vpack.c.bf16 %v2324_v23, %v2324_v23 }
0x16ab   : > { %3015 = vmatmul.mubr.msk.bf16.vlgmr.msra.gmra.mrb[32].mxu0 %vm2365_vm8, %v2325_v25 }
0x177e   : > { %v2403_v27 = vpop.f32.mrb[32].mxu0 }
0x177f   : > { %v2404_v8 = vadd.f32 %v2730_v26, %v2403_v27  ;;  %v3016_v28 = vpop.f32.mrb[33].mxu0 }
0x1780   : > { %v2406_v30 = vpop.f32.mrb[34].mxu0 }
0x1781   : > { %v2409_v32 = vadd.f32 %v2404_v8, %v2227_v46  ;;  %v3017_v33 = vpop.f32.mrb[35].mxu0 }
0x1783   : > { %2410 = vst.msk [vmem:[%s777_s29] sm:$0xff] %vm782_vm0, %v2409_v32 }
0x1784   : > { %3812 = shalt.err (!%p3809_p13)
}
0x1785   : > { %s3813_s18 = scalar_lea.hbm %s4779_s17, 128  ;;  %s3817_s4 = scalar_lea.hbm %s4910_s0, 256 }
0x1786   : > { %p3814_p1 = scmp.ne.s32.totalorder %s4779_s17, %s3813_s18  ;;  %p3818_p0 = scmp.lt.u32.totalorder %s4779_s17, %s4910_s0 }
0x1787   : > { %p3819_p10 = scmp.lt.u32.totalorder %s3817_s4, %s3813_s18  ;;  %p3821_p12 = scmp.lt.u32.totalorder %s3813_s18, %s4779_s17 }
0x1788   : > { %p3815_p3 = pnand %p3814_p1, %p4911_p8 }
0x1789   : > { %p3820_p11 = por %p3819_p10, %p3818_p0 }
0x178a   : > { %p3816_p2 = pneg %p3815_p3 }
0x178b   : > { %p3822_p5 = por %p3821_p12, %p3820_p11 }
0x178d   : > { %p3823_p7 = pnand %p3822_p5, %p3816_p2 }
0x178f   : > { %3826 = shalt.err (!%p3823_p7)
}
0x1790   : > { %3124 = dma.vmem_to_hbm [thread:$0]  (%p4911_p8), %s4781_s21, 128, %s4779_s17, %s2412_s2  }
0x1791 PF: > { %s4912_s20 = sld [smem:[#allocation41_spill]]  ;;  %s4913_s1 = sld [smem:[#allocation44_spill]] }
0x1792   : > { %p4914_p6 = scmp.ne.s32.totalorder %s4885_s23, 0 }
0x1797   : > { %s2437_s19 = sand.u32 1, %s4912_s20   ;;  %p4915_p9 = scmp.ge.s32.totalorder %s4913_s1, 2 }
0x1798   : > { %s2438_s25 = scalar_lea.sflag [#allocation5], %s2437_s19 }
0x1799   : > { %p3180_p4 = pnand %p4915_p9, %p4914_p6 }
0x179b   : > { %3880 = dma.done.wait (!%p3180_p4), %s2438_s25, 128  }
0x179c   : > { %3882 = vsyncadd (!%p3180_p4), %s2438_s25, 4294967168  ;;  %s4916_s24 = sld [smem:[#allocation42_spill]]  ;;  %s4917_s25 = sld [smem:[#allocation43_spill]] }
0x179d   : > { %p38_p13 = scmp.ge.s32.totalorder %s4420_s27, 4   ;;  %s4918_s26 = smov %s4431_s22 }
0x179f   :  { %40 = sbr.rel (!%p38_p13) target bundleno = 20 (0x14), region = 197 }
0x17a6   :  { %2443 = vsyncpa [#allocation4], 1 }
0x17a7   :  { %2445 = vsyncpa [#allocation4 + $0x1], 1 }
0x17a8   :  { %2446 = vsyncpa [#allocation7], 1 }
0x17a9   :  { %2447 = vsyncpa [#allocation10], 1 }
0x17aa   :  { %2448 = vsyncpa [#allocation13], 1 }
0x17ab   :  { %2449 = vsyncpa [#allocation16], 1 }
0x17ac   :  { %2450 = vsyncpa [#allocation19], 1 }
0x17ad   :  { %2451 = vsyncpa [#allocation22], 1 }
0x17ae   :  { %2452 = vsyncpa [#allocation25], 1 }
0x17af   :  { %2453 = vsyncpa [#allocation28], 1 }
0x17b0   :  { %2454 = vsyncpa [#allocation5], 1 }
0x17b1   :  { %2456 = vsyncpa [#allocation5 + $0x1], 1 }

</bundles_post_ra>
